<compile_context>
chip_gen: v6e
topology: v6e:2x2x1
jax: 0.10.0
libtpu: 0.0.40
codegen_flags: <defaults>
</compile_context>

<pallas_src>
import jax
import jax.numpy as jnp
import numpy as np
from jax.experimental import pallas as pl
from jax.experimental.pallas import tpu as pltpu


def global_meanvar_pool(x, weight, bias, batch, num_graphs, *, tile_n=512):
    """x: [N, in_features] f32, weight: [in_features, mid] f32, bias: [1, mid] f32,
    batch: [1, N] int32 (PyG-style, values in [0, num_graphs)).
    Returns [num_graphs, 2*mid] f32."""
    n_nodes, in_features = x.shape
    mid = weight.shape[1]

    # Keep tile_n a multiple of 128 (batch BlockSpec lane dim) but never far larger than N.
    tile_n = max(128, min(tile_n, ((n_nodes + 127) // 128) * 128))
    grid = (pl.cdiv(n_nodes, tile_n),)

    def kernel(x_ref, w_ref, b_ref, batch_ref, out_ref, seg_acc):
        pid = pl.program_id(0)
        nsteps = pl.num_programs(0)

        @pl.when(pid == 0)
        def _init():
            seg_acc[...] = jnp.zeros_like(seg_acc)

        # Linear projection for this tile (MXU, f32 accumulation).  No bias here.
        feats = jnp.dot(x_ref[...], w_ref[...],
                        preferred_element_type=jnp.float32)              # [tile_n, mid]

        # Ragged-tail mask: rows >= n_nodes (partial last DMA block -> undefined data,
        # possibly NaN) are zeroed via select (not multiply, which would keep NaN).
        row_ids = (jax.lax.broadcasted_iota(jnp.int32, (tile_n, 1), 0)
                   + pid * tile_n)                                        # [tile_n, 1]
        in_range = row_ids < n_nodes                                      # [tile_n, 1] bool
        feats = jnp.where(in_range, feats, 0.0)
        cnt_col = in_range.astype(jnp.float32)                            # [tile_n, 1]

        # Fused rhs: [ feats | feats^2 | valid ]  -> one segment matmul accumulates
        # sum, sum-of-squares and count in a single [G, 2*mid+1] scratch.
        rhs = jnp.concatenate([feats, feats * feats, cnt_col], axis=1)    # [tile_n, 2*mid+1]

        G = seg_acc.shape[0]
        batch_ids = batch_ref[...]                                        # [1, tile_n] int32
        g_ids = jax.lax.broadcasted_iota(jnp.int32, (G, tile_n), 0)       # [G, tile_n]
        # Garbage batch values in the masked tail may spuriously match a graph id, but
        # their rhs row is all zeros, so they contribute nothing.
        onehot = (g_ids == batch_ids).astype(jnp.float32)                 # [G, tile_n]

        seg_acc[...] += jnp.dot(onehot, rhs,
                                preferred_element_type=jnp.float32)       # [G, 2*mid+1]

        @pl.when(pid == nsteps - 1)
        def _finalize():
            acc = seg_acc[...]
            s = acc[:, :mid]                                              # segment sums
            sq = acc[:, mid:2 * mid]                                      # segment sum-of-squares
            cnt = acc[:, 2 * mid:]                                        # [G, 1] counts
            cnt_c = jnp.maximum(cnt, 1.0)
            mean_raw = s / cnt_c
            # Algebraically identical to the two-pass sum of squared deviations; clamp
            # >= 0 to guard against f32 cancellation (bias excluded -> smaller magnitudes).
            var_sum = jnp.maximum(sq - cnt * mean_raw * mean_raw, 0.0)
            denom = jnp.maximum(cnt - 1.0, 1.0) + 1e-6
            std = jnp.sqrt(var_sum / denom)
            # Bias added only here (std is translation-invariant).  Empty segments stay 0,
            # matching scatter_mean of bias-included features over zero rows.
            mean = jnp.where(cnt > 0.0, mean_raw + b_ref[...], 0.0)
            out_ref[...] = jnp.concatenate([mean, std], axis=1).astype(out_ref.dtype)

    out_shape = jax.ShapeDtypeStruct((num_graphs, 2 * mid), jnp.float32)

    flops = (2 * n_nodes * in_features * mid             # linear projection
             + n_nodes * mid                              # feats * feats
             + 2 * num_graphs * n_nodes * (2 * mid + 1))  # single fused segment matmul
    bytes_accessed = 4 * (n_nodes * in_features + n_nodes
                          + in_features * mid + mid
                          + num_graphs * 2 * mid)

    return pl.pallas_call(
        kernel,
        out_shape=out_shape,
        grid=grid,
        in_specs=[
            pl.BlockSpec((tile_n, in_features), lambda i: (i, 0)),   # x tile (streamed)
            pl.BlockSpec((in_features, mid), lambda i: (0, 0)),      # weight (resident)
            pl.BlockSpec((1, mid), lambda i: (0, 0)),                # bias (resident)
            pl.BlockSpec((1, tile_n), lambda i: (0, i)),             # batch tile (streamed)
        ],
        out_specs=pl.BlockSpec((num_graphs, 2 * mid), lambda i: (0, 0)),
        scratch_shapes=[
            pltpu.VMEM((num_graphs, 2 * mid + 1), jnp.float32),      # [sum | sumsq | count]
        ],
        compiler_params=pltpu.CompilerParams(
            dimension_semantics=("arbitrary",),
            vmem_limit_bytes=32 * 1024 * 1024,
        ),
        cost_estimate=pl.CostEstimate(
            flops=flops, transcendentals=0, bytes_accessed=bytes_accessed),
    )(x, weight, bias, batch)


def reference(x, weight, bias, batch_1d, num_graphs):
    feats = x @ weight + bias                                             # [N, mid]
    onehot = (jnp.arange(num_graphs)[:, None] == batch_1d[None, :]).astype(jnp.float32)
    count = onehot.sum(axis=1, keepdims=True)
    count_c = jnp.maximum(count, 1.0)
    mean = (onehot @ feats) / count_c
    diff = feats - mean[batch_1d]
    var_sum = onehot @ (diff * diff)
    denom = jnp.maximum(count - 1.0, 1.0) + 1e-6
    std = jnp.sqrt(var_sum / denom)
    return jnp.concatenate([mean, std], axis=-1)


if __name__ == "__main__":
    key = jax.random.PRNGKey(0)
    k_x, k_w, k_b = jax.random.split(key, 3)

    # Module config: in_features=8, out_features=8 -> mid_features=4
    in_features = 8
    out_features = 8
    assert out_features % 2 == 0
    mid_features = out_features // 2

    # 600 nodes across 3 graphs; not a multiple of any tile size -> exercises the
    # in-kernel ragged-tail masking (no wrapper-side padding copy anymore).
    N = 600
    num_graphs = 3
    sizes = [250, 180, 170]
    assert sum(sizes) == N

    x = jax.random.normal(k_x, (N, in_features), dtype=jnp.float32)
    bound = 1.0 / np.sqrt(in_features)
    weight = jax.random.uniform(k_w, (in_features, mid_features),
                                minval=-bound, maxval=bound, dtype=jnp.float32)
    bias = jax.random.uniform(k_b, (1, mid_features),
                              minval=-bound, maxval=bound, dtype=jnp.float32)

    # Sorted graph assignment as produced by PyG batching.
    batch_1d = jnp.concatenate(
        [jnp.full((s,), g, dtype=jnp.int32) for g, s in enumerate(sizes)])
    batch = batch_1d.reshape(1, N)

    ref = reference(x, weight, bias, batch_1d, num_graphs)

    # tile_n=512 -> 2 grid steps (88-row ragged tail); tile_n=128 -> 5 steps
    # (multi-step accumulation + ragged tail).  Both must match the reference.
    for tn in (512, 128):
        out = global_meanvar_pool(x, weight, bias, batch, num_graphs, tile_n=tn)
        out = jax.block_until_ready(out)
        np.testing.assert_allclose(np.asarray(out), np.asarray(ref),
                                   rtol=1e-4, atol=1e-5)

    print("KERNEL_OK")
</pallas_src>

<mosaic_0001>
module attributes {stable_mosaic.version = 11 : i64} {
  func.func @kernel(%arg0: i32, %arg1: memref<512x8xf32, #tpu.memory_space<vmem>>, %arg2: memref<8x4xf32, #tpu.memory_space<vmem>>, %arg3: memref<1x4xf32, #tpu.memory_space<vmem>>, %arg4: memref<1x512xi32, #tpu.memory_space<vmem>>, %arg5: memref<3x8xf32, #tpu.memory_space<vmem>>, %arg6: memref<3x9xf32, #tpu.memory_space<vmem>>) attributes {dimension_semantics = [#tpu.dimension_semantics<arbitrary>], iteration_bounds = array<i64: 2>, scalar_prefetch = 0 : i64, scratch_operands = 1 : i64, tpu.core_type = #tpu.core_type<tc>, window_params = [{transform_indices = @transform_0, window_bounds = array<i64: 512, 8>}, {pipeline_mode = #tpu.pipeline_mode<synchronous>, transform_indices = @transform_1, window_bounds = array<i64: 8, 4>}, {pipeline_mode = #tpu.pipeline_mode<synchronous>, transform_indices = @transform_2, window_bounds = array<i64: 1, 4>}, {transform_indices = @transform_3, window_bounds = array<i64: 1, 512>}, {pipeline_mode = #tpu.pipeline_mode<synchronous>, transform_indices = @transform_4, window_bounds = array<i64: 3, 8>}]} {
    %c0_i32 = arith.constant 0 : i32
    %0 = arith.cmpi eq, %arg0, %c0_i32 : i32
    %1 = arith.extui %0 : i1 to i32
    %c0_i32_0 = arith.constant 0 : i32
    %2 = arith.cmpi ne, %1, %c0_i32_0 : i32
    scf.if %2 {
      %cst_13 = arith.constant 0.000000e+00 : f32
      %33 = vector.broadcast %cst_13 : f32 to vector<3x9xf32>
      %c0_14 = arith.constant 0 : index
      %c0_15 = arith.constant 0 : index
      %34 = vector.load %arg6[%c0_14, %c0_15] : memref<3x9xf32, #tpu.memory_space<vmem>>, vector<3x9xf32>
      tpu.vector_store %arg6[%c0_14, %c0_15], %33 {strides = array<i32>} : memref<3x9xf32, #tpu.memory_space<vmem>>, vector<3x9xf32>,
    } else {
    }
    %c0 = arith.constant 0 : index
    %c0_1 = arith.constant 0 : index
    %3 = vector.load %arg1[%c0, %c0_1] : memref<512x8xf32, #tpu.memory_space<vmem>>, vector<512x8xf32>
    %c0_2 = arith.constant 0 : index
    %c0_3 = arith.constant 0 : index
    %4 = vector.load %arg2[%c0_2, %c0_3] : memref<8x4xf32, #tpu.memory_space<vmem>>, vector<8x4xf32>
    %cst = arith.constant dense<0.000000e+00> : vector<512x4xf32>
    %5 = tpu.matmul %3, %4, %cst {dimension_numbers = #tpu.dot_dimension_numbers<[1], [0], [0], [1], [0, 0, 1, 1], [], []>} : vector<512x8xf32>, vector<8x4xf32>, vector<512x4xf32> -> vector<512x4xf32>
    %6 = tpu.iota {dimensions = array<i32: 0>} : vector<512x1xi32>
    %c512_i32 = arith.constant 512 : i32
    %7 = arith.muli %arg0, %c512_i32 : i32
    %8 = vector.broadcast %7 : i32 to vector<512x1xi32>
    %9 = arith.addi %6, %8 : vector<512x1xi32>
    %c600_i32 = arith.constant 600 : i32
    %10 = vector.broadcast %c600_i32 : i32 to vector<512x1xi32>
    %11 = arith.cmpi slt, %9, %10 : vector<512x1xi32>
    %cst_4 = arith.constant 0.000000e+00 : f32
    %12 = vector.shape_cast %11 : vector<512x1xi1> to vector<512x1xi1>
    %13 = vector.broadcast %12 : vector<512x1xi1> to vector<512x4xi1>
    %14 = vector.broadcast %cst_4 : f32 to vector<512x4xf32>
    %15 = arith.select %13, %5, %14 : vector<512x4xi1>, vector<512x4xf32>
    %16 = arith.extui %11 : vector<512x1xi1> to vector<512x1xi32>
    %17 = arith.sitofp %16 : vector<512x1xi32> to vector<512x1xf32>
    %18 = arith.mulf %15, %15 : vector<512x4xf32>
    %19 = tpu.concatenate %15, %18, %17 in 1 : vector<512x4xf32>, vector<512x4xf32>, vector<512x1xf32> -> vector<512x9xf32>
    %c0_5 = arith.constant 0 : index
    %c0_6 = arith.constant 0 : index
    %20 = vector.load %arg4[%c0_5, %c0_6] : memref<1x512xi32, #tpu.memory_space<vmem>>, vector<1x512xi32>
    %21 = tpu.iota {dimensions = array<i32: 0>} : vector<3x512xi32>
    %22 = vector.broadcast %20 : vector<1x512xi32> to vector<3x512xi32>
    %23 = arith.cmpi eq, %21, %22 : vector<3x512xi32>
    %24 = arith.extui %23 : vector<3x512xi1> to vector<3x512xi32>
    %25 = arith.sitofp %24 : vector<3x512xi32> to vector<3x512xf32>
    %c0_7 = arith.constant 0 : index
    %c0_8 = arith.constant 0 : index
    %26 = vector.load %arg6[%c0_7, %c0_8] : memref<3x9xf32, #tpu.memory_space<vmem>>, vector<3x9xf32>
    %cst_9 = arith.constant dense<0.000000e+00> : vector<3x9xf32>
    %27 = tpu.matmul %25, %19, %cst_9 {dimension_numbers = #tpu.dot_dimension_numbers<[1], [0], [0], [1], [0, 0, 1, 1], [], []>} : vector<3x512xf32>, vector<512x9xf32>, vector<3x9xf32> -> vector<3x9xf32>
    %28 = arith.addf %26, %27 : vector<3x9xf32>
    %c0_10 = arith.constant 0 : index
    %c0_11 = arith.constant 0 : index
    %29 = vector.load %arg6[%c0_10, %c0_11] : memref<3x9xf32, #tpu.memory_space<vmem>>, vector<3x9xf32>
    tpu.vector_store %arg6[%c0_10, %c0_11], %28 {strides = array<i32>} : memref<3x9xf32, #tpu.memory_space<vmem>>, vector<3x9xf32>,
    %c1_i32 = arith.constant 1 : i32
    %30 = arith.cmpi eq, %arg0, %c1_i32 : i32
    %31 = arith.extui %30 : i1 to i32
    %c0_i32_12 = arith.constant 0 : i32
    %32 = arith.cmpi ne, %31, %c0_i32_12 : i32
    scf.if %32 {
      %c0_13 = arith.constant 0 : index
      %c0_14 = arith.constant 0 : index
      %33 = vector.load %arg6[%c0_13, %c0_14] : memref<3x9xf32, #tpu.memory_space<vmem>>, vector<3x9xf32>
      %34 = vector.extract_strided_slice %33 {offsets = [0, 0], sizes = [3, 4], strides = [1, 1]} : vector<3x9xf32> to vector<3x4xf32>
      %35 = vector.extract_strided_slice %33 {offsets = [0, 4], sizes = [3, 4], strides = [1, 1]} : vector<3x9xf32> to vector<3x4xf32>
      %36 = vector.extract_strided_slice %33 {offsets = [0, 8], sizes = [3, 1], strides = [1, 1]} : vector<3x9xf32> to vector<3x1xf32>
      %cst_15 = arith.constant 1.000000e+00 : f32
      %37 = vector.broadcast %cst_15 : f32 to vector<3x1xf32>
      %38 = arith.maximumf %36, %37 : vector<3x1xf32>
      %39 = vector.broadcast %38 : vector<3x1xf32> to vector<3x4xf32>
      %40 = arith.divf %34, %39 : vector<3x4xf32>
      %41 = vector.broadcast %36 : vector<3x1xf32> to vector<3x4xf32>
      %42 = arith.mulf %41, %40 : vector<3x4xf32>
      %43 = arith.mulf %42, %40 : vector<3x4xf32>
      %44 = arith.subf %35, %43 : vector<3x4xf32>
      %cst_16 = arith.constant 0.000000e+00 : f32
      %45 = vector.broadcast %cst_16 : f32 to vector<3x4xf32>
      %46 = arith.maximumf %44, %45 : vector<3x4xf32>
      %cst_17 = arith.constant 1.000000e+00 : f32
      %47 = vector.broadcast %cst_17 : f32 to vector<3x1xf32>
      %48 = arith.subf %36, %47 : vector<3x1xf32>
      %cst_18 = arith.constant 1.000000e+00 : f32
      %49 = vector.broadcast %cst_18 : f32 to vector<3x1xf32>
      %50 = arith.maximumf %48, %49 : vector<3x1xf32>
      %cst_19 = arith.constant 9.99999997E-7 : f32
      %51 = vector.broadcast %cst_19 : f32 to vector<3x1xf32>
      %52 = arith.addf %50, %51 : vector<3x1xf32>
      %53 = vector.broadcast %52 : vector<3x1xf32> to vector<3x4xf32>
      %54 = arith.divf %46, %53 : vector<3x4xf32>
      %55 = math.sqrt %54 : vector<3x4xf32>
      %cst_20 = arith.constant 0.000000e+00 : f32
      %56 = vector.broadcast %cst_20 : f32 to vector<3x1xf32>
      %57 = arith.cmpf ogt, %36, %56 : vector<3x1xf32>
      %c0_21 = arith.constant 0 : index
      %c0_22 = arith.constant 0 : index
      %58 = vector.load %arg3[%c0_21, %c0_22] : memref<1x4xf32, #tpu.memory_space<vmem>>, vector<1x4xf32>
      %59 = vector.broadcast %58 : vector<1x4xf32> to vector<3x4xf32>
      %60 = arith.addf %40, %59 : vector<3x4xf32>
      %cst_23 = arith.constant 0.000000e+00 : f32
      %61 = vector.shape_cast %57 : vector<3x1xi1> to vector<3x1xi1>
      %62 = vector.broadcast %61 : vector<3x1xi1> to vector<3x4xi1>
      %63 = vector.broadcast %cst_23 : f32 to vector<3x4xf32>
      %64 = arith.select %62, %60, %63 : vector<3x4xi1>, vector<3x4xf32>
      %65 = tpu.concatenate %64, %55 in 1 : vector<3x4xf32>, vector<3x4xf32> -> vector<3x8xf32>
      %c0_24 = arith.constant 0 : index
      %c0_25 = arith.constant 0 : index
      %66 = vector.load %arg5[%c0_24, %c0_25] : memref<3x8xf32, #tpu.memory_space<vmem>>, vector<3x8xf32>
      tpu.vector_store %arg5[%c0_24, %c0_25], %65 {strides = array<i32>} : memref<3x8xf32, #tpu.memory_space<vmem>>, vector<3x8xf32>,
    } else {
    }
    return
  }
  func.func @transform_0(%arg0: i32) -> (i32, i32) {
    %c0_i32 = arith.constant 0 : i32
    %c0_i32_0 = arith.constant 0 : i32
    return %arg0, %c0_i32 : i32, i32
  }
  func.func @transform_1(%arg0: i32) -> (i32, i32) {
    %c0_i32 = arith.constant 0 : i32
    %c0_i32_0 = arith.constant 0 : i32
    %c0_i32_1 = arith.constant 0 : i32
    return %c0_i32, %c0_i32_0 : i32, i32
  }
  func.func @transform_2(%arg0: i32) -> (i32, i32) {
    %c0_i32 = arith.constant 0 : i32
    %c0_i32_0 = arith.constant 0 : i32
    %c0_i32_1 = arith.constant 0 : i32
    return %c0_i32, %c0_i32_0 : i32, i32
  }
  func.func @transform_3(%arg0: i32) -> (i32, i32) {
    %c0_i32 = arith.constant 0 : i32
    %c0_i32_0 = arith.constant 0 : i32
    return %c0_i32, %arg0 : i32, i32
  }
  func.func @transform_4(%arg0: i32) -> (i32, i32) {
    %c0_i32 = arith.constant 0 : i32
    %c0_i32_0 = arith.constant 0 : i32
    %c0_i32_1 = arith.constant 0 : i32
    return %c0_i32, %c0_i32_0 : i32, i32
  }
}

</mosaic_0001>

<bundles_post_ra>
// kernel: tpu_custom_call.1
= control target key start
LH: loop header
LB: loop body
LE: loop exit
PB: predicated region body
PF: predicated region fallthrough
CT: control target
= control target key end

     0   :  { %9 = vsyncpa [#allocation4], 0  ;;  %s2569_s15 = smov 0   ;;  %s4134_s0 = inlined_call_operand.vmem [shape: f32[600,8], index: 0, kind: input, shape index: {}]   ;;  %s4135_s1 = inlined_call_operand.vmem [shape: f32[8,4], index: 1, kind: input, shape index: {}]   ;;  %s4136_s2 = inlined_call_operand.vmem [shape: f32[1,4], index: 2, kind: input, shape index: {}]   ;;  %s4137_s3 = inlined_call_operand.vmem [shape: s32[1,600], index: 3, kind: input, shape index: {}]   ;;  %s4138_s4 = inlined_call_operand.hbm [shape: f32[3,8], index: 4, kind: output, shape index: {}]  }
   0x1 LB: > { %s2575_s16 = sadd.s32 4294967295, %s2534_s15   ;;  %p2086_p0 = scmp.ge.s32.totalorder %s2534_s15, 1  ;;  %s2534_s15 = sphi %s2569_s15, %s15_s15  }
   0x2   : > { %p185_p1 = scmp.lt.s32.totalorder %s2534_s15, 3 }
   0x4   : > { %p186_p2 = pnand %p2086_p0, %p185_p1 }
   0x6   : > { %189 = sbr.rel (%p186_p2) target bundleno = 1004 (0x3ec), region = 36 }
   0xb   : > { %s2087_s17 = sshll.u32 %s2575_s16, 6  ;;  %s2089_s18 = sshll.u32 %s2575_s16, 2 }
   0xc   : > { %p223_p3 = scmp.lt.s32.totalorder %s2087_s17, 74  ;;  %p237_p4 = scmp.lt.s32.totalorder %s2089_s18, 4 }
   0xd   : > { %p2090_p5 = scmp.ne.s32.totalorder %s2575_s16, 0 }
   0xe   : > { %s4565_s17 = smov (!%p223_p3, %s2087_s17), 74  ;;  %s4567_s18 = smov (!%p237_p4, %s2089_s18), 4 }
   0xf   : > { %s2088_s19 = sshll.u32 %s4565_s17, 3  ;;  %s239_s25 = scalar_lea.vmem %s4137_s3, %s4567_s18 }
  0x10   : > { %s2586_s22 = scalar_lea.vmem %s4134_s0, %s2088_s19  ;;  %248 = sbr.rel (%p2090_p5) target bundleno = 23 (0x17), region = 40 }
  0x15   : > { %vm249_vm0 = vcmask 67584   ;;  %v2536_v0 = vmov 0.0  }
  0x16   : > { %250 = vst.msk [vmem:[#allocation2] sm:$0x7] %vm249_vm0, %v2536_v0 }
  0x17 PF: > { %v315_v1 = vld [vmem:[%s4135_s1] sm:$0xff]  ;;  %vm316_vm1 = vcmask 64512   ;;  %v252_v3 = vld [vmem:[%s2586_s22 + $0x8] sm:$0xff]  ;;  %v253_v4 = vld [vmem:[%s2586_s22 + $0x10] sm:$0xff]  ;;  %s2155_s28 = sshll.u32 %s2575_s16, 9  ;;  %s2537_s29 = smov 4  }
  0x18   : > { %v251_v2 = vld [vmem:[%s2586_s22] sm:$0xff]  ;;  %2370 = vmatprep.subr.mxu0 %v315_v1  ;;  %2468 = vmatprep.subr.mxu1 %v315_v1  ;;  %v254_v5 = vld [vmem:[%s2586_s22 + $0x18] sm:$0xff]  ;;  %v256_v7 = vld [vmem:[%s2586_s22 + $0x28] sm:$0xff]  ;;  %p2228_p6 = scmp.ne.s32.totalorder %s2575_s16, 1 }
  0x19   : > { %2372 = vmatprep.mubr.msk.f32.mxu0 %vm316_vm1, %v251_v2  ;;  %2371 = vmatpush3.msra.mxu0 %v315_v1  ;;  %v255_v6 = vld [vmem:[%s2586_s22 + $0x20] sm:$0xff]  ;;  %v257_v8 = vld [vmem:[%s2586_s22 + $0x30] sm:$0xff]  ;;  %v294_v10 = vld [vmem:[%s2586_s22 + $0x158] sm:$0xff]  ;;  %v894_v2 = vlaneseq  ;;  %s2542_s6 = smov (!%p2228_p6), 4  }
  0x1a   : > { %2373 = vmatmul.mubr.msk.f32.vlgmr.msra.gmra.mxu0 %vm316_vm1, %v252_v3  ;;  %2469 = vmatpush3.msra.mxu1 %v315_v1  ;;  %v293_v9 = vld [vmem:[%s2586_s22 + $0x150] sm:$0xff]  ;;  %v295_v11 = vld [vmem:[%s2586_s22 + $0x160] sm:$0xff]  ;;  %v258_v12 = vld [vmem:[%s2586_s22 + $0x38] sm:$0xff] }
  0x1b   : > { %2375 = vmatprep.mubr.msk.f32.mxu0 %vm316_vm1, %v253_v4  ;;  %2435 = vmatprep.mubr.msk.f32.mxu1 %vm316_vm1, %v293_v9  ;;  %v296_v13 = vld [vmem:[%s2586_s22 + $0x168] sm:$0xff]  ;;  %v259_v14 = vld [vmem:[%s2586_s22 + $0x40] sm:$0xff]  ;;  %v297_v15 = vld [vmem:[%s2586_s22 + $0x170] sm:$0xff]  ;;  %v2724_v3 = vshrl.u32 %v894_v2, 7 }
  0x1c   : > { %2436 = vmatmul.mubr.msk.f32.vlgmr.msra.gmra.mxu1 %vm316_vm1, %v294_v10  ;;  %v260_v16 = vld [vmem:[%s2586_s22 + $0x48] sm:$0xff]  ;;  %v298_v17 = vld [vmem:[%s2586_s22 + $0x178] sm:$0xff]  ;;  %v261_v18 = vld [vmem:[%s2586_s22 + $0x50] sm:$0xff] }
  0x1d   : > { %2438 = vmatprep.mubr.msk.f32.mxu1 %vm316_vm1, %v295_v11  ;;  %v299_v19 = vld [vmem:[%s2586_s22 + $0x180] sm:$0xff]  ;;  %v262_v20 = vld [vmem:[%s2586_s22 + $0x58] sm:$0xff]  ;;  %v300_v21 = vld [vmem:[%s2586_s22 + $0x188] sm:$0xff]  ;;  %v896_v4 = vadd.s32 8, %v2724_v3  ;;  %v897_v11 = vadd.s32 16, %v2724_v3 }
  0x1e   : > { %2376 = vmatmul.mubr.msk.f32.gmra.mxu0 %vm316_vm1, %v254_v5  ;;  %v263_v22 = vld [vmem:[%s2586_s22 + $0x60] sm:$0xff]  ;;  %v301_v23 = vld [vmem:[%s2586_s22 + $0x190] sm:$0xff]  ;;  %v264_v24 = vld [vmem:[%s2586_s22 + $0x68] sm:$0xff]  ;;  %v2728_v5 = vstv %s2155_s28 }
  0x1f   : > { %2378 = vmatprep.mubr.msk.f32.mxu0 %vm316_vm1, %v255_v6  ;;  %v302_v25 = vld [vmem:[%s2586_s22 + $0x198] sm:$0xff]  ;;  %v265_v26 = vld [vmem:[%s2586_s22 + $0x70] sm:$0xff]  ;;  %v303_v27 = vld [vmem:[%s2586_s22 + $0x1a0] sm:$0xff]  ;;  %v2731_v6 = vadd.s32 %v2728_v5, %v896_v4 }
  0x20   : > { %2439 = vmatmul.mubr.msk.f32.gmra.mxu1 %vm316_vm1, %v296_v13  ;;  %v266_v28 = vld [vmem:[%s2586_s22 + $0x78] sm:$0xff]  ;;  %v304_v29 = vld [vmem:[%s2586_s22 + $0x1a8] sm:$0xff]  ;;  %v267_v30 = vld [vmem:[%s2586_s22 + $0x80] sm:$0xff] }
  0x21   : > { %2441 = vmatprep.mubr.msk.f32.mxu1 %vm316_vm1, %v297_v15  ;;  %v305_v31 = vld [vmem:[%s2586_s22 + $0x1b0] sm:$0xff]  ;;  %v268_v32 = vld [vmem:[%s2586_s22 + $0x88] sm:$0xff]  ;;  %v306_v33 = vld [vmem:[%s2586_s22 + $0x1b8] sm:$0xff]  ;;  %4293 = vst [vmem:[#allocation6_spill] sm:$0xff] %v2731_v6  ;;  %vm4141_vm2 = vcmp.lt.s32.totalorder %v2731_v6, 600 }
  0x22   : > { %2379 = vmatmul.mubr.msk.f32.gmra.mxu0 %vm316_vm1, %v256_v7  ;;  %v269_v34 = vld [vmem:[%s2586_s22 + $0x90] sm:$0xff]  ;;  %v307_v35 = vld [vmem:[%s2586_s22 + $0x1c0] sm:$0xff]  ;;  %v270_v36 = vld [vmem:[%s2586_s22 + $0x98] sm:$0xff]  ;;  %v2735_v7 = vadd.s32 %v2728_v5, %v2724_v3 }
  0x23   : > { %2381 = vmatprep.mubr.msk.f32.mxu0 %vm316_vm1, %v257_v8  ;;  %v308_v37 = vld [vmem:[%s2586_s22 + $0x1c8] sm:$0xff]  ;;  %v271_v38 = vld [vmem:[%s2586_s22 + $0xa0] sm:$0xff]  ;;  %v309_v39 = vld [vmem:[%s2586_s22 + $0x1d0] sm:$0xff]  ;;  %v898_v8 = vadd.s32 24, %v2724_v3 }
  0x24   : > { %2442 = vmatmul.mubr.msk.f32.gmra.mxu1 %vm316_vm1, %v298_v17  ;;  %v272_v40 = vld [vmem:[%s2586_s22 + $0xa8] sm:$0xff]  ;;  %v310_v41 = vld [vmem:[%s2586_s22 + $0x1d8] sm:$0xff]  ;;  %v273_v42 = vld [vmem:[%s2586_s22 + $0xb0] sm:$0xff]  ;;  %4294 = vst [vmem:[#allocation7_spill] sm:$0xff] %v2735_v7  ;;  %vm4139_vm3 = vcmp.lt.s32.totalorder %v2735_v7, 600  ;;  %v2757_v17 = vadd.s32 %v2728_v5, %v897_v11  ;;  %v917_v7 = vadd.s32 176, %v2724_v3 }
  0x25   : > { %2444 = vmatprep.mubr.msk.f32.mxu1 %vm316_vm1, %v299_v19  ;;  %v311_v43 = vld [vmem:[%s2586_s22 + $0x1e0] sm:$0xff]  ;;  %v274_v44 = vld [vmem:[%s2586_s22 + $0xb8] sm:$0xff]  ;;  %v312_v45 = vld [vmem:[%s2586_s22 + $0x1e8] sm:$0xff]  ;;  %v2741_v10 = vadd.s32 %v2728_v5, %v898_v8 }
  0x26   : > { %2382 = vmatmul.mubr.msk.f32.gmra.mxu0 %vm316_vm1, %v258_v12  ;;  %v275_v46 = vld [vmem:[%s2586_s22 + $0xc0] sm:$0xff]  ;;  %v313_v47 = vld [vmem:[%s2586_s22 + $0x1f0] sm:$0xff]  ;;  %v276_v48 = vld [vmem:[%s2586_s22 + $0xc8] sm:$0xff]  ;;  %4298 = vst [vmem:[#allocation11_spill] sm:$0xff] %v2757_v17  ;;  %vm4144_vm5 = vcmp.lt.s32.totalorder %v2757_v17, 600 }
  0x27   : > { %2384 = vmatprep.mubr.msk.f32.mxu0 %vm316_vm1, %v259_v14  ;;  %v314_v49 = vld [vmem:[%s2586_s22 + $0x1f8] sm:$0xff]  ;;  %v277_v50 = vld [vmem:[%s2586_s22 + $0xd0] sm:$0xff]  ;;  %v279_v52 = vld [vmem:[%s2586_s22 + $0xe0] sm:$0xff]  ;;  %4295 = vst [vmem:[#allocation8_spill] sm:$0xff] %v2741_v10  ;;  %vm4148_vm4 = vcmp.lt.s32.totalorder %v2741_v10, 600  ;;  %v922_v10 = vadd.s32 216, %v2724_v3 }
  0x28   : > { %2445 = vmatmul.mubr.msk.f32.gmra.mxu1 %vm316_vm1, %v300_v21  ;;  %v278_v51 = vld [vmem:[%s2586_s22 + $0xd8] sm:$0xff]  ;;  %v280_v53 = vld [vmem:[%s2586_s22 + $0xe8] sm:$0xff]  ;;  %v281_v54 = vld [vmem:[%s2586_s22 + $0xf0] sm:$0xff] }
  0x29   : > { %2447 = vmatprep.mubr.msk.f32.mxu1 %vm316_vm1, %v301_v23  ;;  %v282_v55 = vld [vmem:[%s2586_s22 + $0xf8] sm:$0xff]  ;;  %v283_v56 = vld [vmem:[%s2586_s22 + $0x100] sm:$0xff]  ;;  %v284_v57 = vld [vmem:[%s2586_s22 + $0x108] sm:$0xff] }
  0x2a   : > { %2385 = vmatmul.mubr.msk.f32.gmra.mxu0 %vm316_vm1, %v260_v16  ;;  %v285_v58 = vld [vmem:[%s2586_s22 + $0x110] sm:$0xff]  ;;  %v286_v59 = vld [vmem:[%s2586_s22 + $0x118] sm:$0xff]  ;;  %v287_v60 = vld [vmem:[%s2586_s22 + $0x120] sm:$0xff] }
  0x2b   : > { %2387 = vmatprep.mubr.msk.f32.mxu0 %vm316_vm1, %v261_v18  ;;  %v288_v61 = vld [vmem:[%s2586_s22 + $0x128] sm:$0xff]  ;;  %v289_v62 = vld [vmem:[%s2586_s22 + $0x130] sm:$0xff]  ;;  %v290_v63 = vld [vmem:[%s2586_s22 + $0x138] sm:$0xff]  ;;  %v900_v18 = vadd.s32 40, %v2724_v3 }
  0x2c   : > { %2448 = vmatmul.mubr.msk.f32.gmra.mxu1 %vm316_vm1, %v302_v25  ;;  %v291_v0 = vld [vmem:[%s2586_s22 + $0x140] sm:$0xff]  ;;  %v292_v1 = vld [vmem:[%s2586_s22 + $0x148] sm:$0xff] }
  0x2d   : > { %2450 = vmatprep.mubr.msk.f32.mxu1 %vm316_vm1, %v303_v27  ;;  %v2769_v23 = vadd.s32 %v2728_v5, %v900_v18  ;;  %v905_v18 = vadd.s32 80, %v2724_v3 }
  0x2e   : > { %2388 = vmatmul.mubr.msk.f32.gmra.mxu0 %vm316_vm1, %v262_v20 }
  0x2f   : > { %2390 = vmatprep.mubr.msk.f32.mxu0 %vm316_vm1, %v263_v22  ;;  %4300 = vst [vmem:[#allocation13_spill] sm:$0xff] %v2769_v23  ;;  %vm4166_vm6 = vcmp.lt.s32.totalorder %v2769_v23, 600 }
  0x30   : > { %2451 = vmatmul.mubr.msk.f32.gmra.mxu1 %vm316_vm1, %v304_v29 }
  0x31   : > { %2453 = vmatprep.mubr.msk.f32.mxu1 %vm316_vm1, %v305_v31  ;;  %v902_v31 = vadd.s32 56, %v2724_v3 }
  0x32   : > { %2391 = vmatmul.mubr.msk.f32.gmra.mxu0 %vm316_vm1, %v264_v24  ;;  %v899_v24 = vadd.s32 32, %v2724_v3 }
  0x33   : > { %2393 = vmatprep.mubr.msk.f32.mxu0 %vm316_vm1, %v265_v26 }
  0x34   : > { %2454 = vmatmul.mubr.msk.f32.gmra.mxu1 %vm316_vm1, %v306_v33  ;;  %v2782_v29 = vadd.s32 %v2728_v5, %v899_v24 }
  0x35   : > { %2456 = vmatprep.mubr.msk.f32.mxu1 %vm316_vm1, %v307_v35 }
  0x36   : > { %2394 = vmatmul.mubr.msk.f32.gmra.mxu0 %vm316_vm1, %v266_v28  ;;  %4302 = vst [vmem:[#allocation15_spill] sm:$0xff] %v2782_v29  ;;  %vm4157_vm7 = vcmp.lt.s32.totalorder %v2782_v29, 600 }
  0x37   : > { %2396 = vmatprep.mubr.msk.f32.mxu0 %vm316_vm1, %v267_v30 }
  0x38   : > { %2457 = vmatmul.mubr.msk.f32.gmra.mxu1 %vm316_vm1, %v308_v37  ;;  %v901_v37 = vadd.s32 48, %v2724_v3 }
  0x39   : > { %2459 = vmatprep.mubr.msk.f32.mxu1 %vm316_vm1, %v309_v39 }
  0x3a   : > { %2397 = vmatmul.mubr.msk.f32.gmra.mxu0 %vm316_vm1, %v268_v32 }
  0x3b   : > { %2399 = vmatprep.mubr.msk.f32.mxu0 %vm316_vm1, %v269_v34 }
  0x3c   : > { %2460 = vmatmul.mubr.msk.f32.gmra.mxu1 %vm316_vm1, %v310_v41 }
  0x3d   : > { %2462 = vmatprep.mubr.msk.f32.mxu1 %vm316_vm1, %v311_v43 }
  0x3e   : > { %2400 = vmatmul.mubr.msk.f32.gmra.mxu0 %vm316_vm1, %v270_v36  ;;  %v2796_v36 = vadd.s32 %v2728_v5, %v902_v31 }
  0x3f   : > { %2402 = vmatprep.mubr.msk.f32.mxu0 %vm316_vm1, %v271_v38 }
  0x40   : > { %2463 = vmatmul.mubr.msk.f32.gmra.mxu1 %vm316_vm1, %v312_v45  ;;  %4304 = vst [vmem:[#allocation17_spill] sm:$0xff] %v2796_v36  ;;  %vm4177_vm8 = vcmp.lt.s32.totalorder %v2796_v36, 600  ;;  %v904_v45 = vadd.s32 72, %v2724_v3  ;;  %v932_v36 = vadd.s32 296, %v2724_v3 }
  0x41   : > { %2465 = vmatprep.mubr.msk.f32.mxu1 %vm316_vm1, %v313_v47 }
  0x42   : > { %2403 = vmatmul.mubr.msk.f32.gmra.mxu0 %vm316_vm1, %v272_v40 }
  0x43   : > { %2405 = vmatprep.mubr.msk.f32.mxu0 %vm316_vm1, %v273_v42  ;;  %v910_v42 = vadd.s32 120, %v2724_v3 }
  0x44   : > { %2466 = vmatmul.mubr.msk.f32.gmra.mxu1 %vm316_vm1, %v314_v49 }
  0x46   : > { %2406 = vmatmul.mubr.msk.f32.gmra.mxu0 %vm316_vm1, %v274_v44  ;;  %v2811_v44 = vadd.s32 %v2728_v5, %v901_v37  ;;  %v2910_v37 = vadd.s32 %v2728_v5, %v905_v18 }
  0x47   : > { %2408 = vmatprep.mubr.msk.f32.mxu0 %vm316_vm1, %v275_v46 }
  0x48   : > { %4306 = vst [vmem:[#allocation19_spill] sm:$0xff] %v2811_v44  ;;  %vm4171_vm9 = vcmp.lt.s32.totalorder %v2811_v44, 600  ;;  %v938_v44 = vadd.s32 344, %v2724_v3 }
  0x4a   : > { %2409 = vmatmul.mubr.msk.f32.gmra.mxu0 %vm316_vm1, %v276_v48 }
  0x4b   : > { %2411 = vmatprep.mubr.msk.f32.mxu0 %vm316_vm1, %v277_v50  ;;  %v2824_v50 = vadd.s32 %v2728_v5, %v910_v42 }
  0x4d   : > { %vm1040_vm10 = vcmp.lt.s32.totalorder %v2824_v50, 600 }
  0x4e   : > { %2412 = vmatmul.mubr.msk.f32.gmra.mxu0 %vm316_vm1, %v278_v51  ;;  %v912_v51 = vadd.s32 136, %v2724_v3 }
  0x4f   : > { %2414 = vmatprep.mubr.msk.f32.mxu0 %vm316_vm1, %v279_v52 }
  0x52   : > { %2415 = vmatmul.mubr.msk.f32.gmra.mxu0 %vm316_vm1, %v280_v53  ;;  %v2833_v53 = vadd.s32 %v2728_v5, %v904_v45 }
  0x53   : > { %2417 = vmatprep.mubr.msk.f32.mxu0 %vm316_vm1, %v281_v54  ;;  %v903_v54 = vadd.s32 64, %v2724_v3 }
  0x54   : > { %vm4200_vm11 = vcmp.lt.s32.totalorder %v2833_v53, 600 }
  0x56   : > { %2418 = vmatmul.mubr.msk.f32.gmra.mxu0 %vm316_vm1, %v282_v55 }
  0x57   : > { %2420 = vmatprep.mubr.msk.f32.mxu0 %vm316_vm1, %v283_v56  ;;  %v911_v56 = vadd.s32 128, %v2724_v3 }
  0x59   : > { %v2862_v2 = vadd.s32 %v2728_v5, %v911_v56 }
  0x5a   : > { %2421 = vmatmul.mubr.msk.f32.gmra.mxu0 %vm316_vm1, %v284_v57 }
  0x5b   : > { %2423 = vmatprep.mubr.msk.f32.mxu0 %vm316_vm1, %v285_v58  ;;  %4311 = vst [vmem:[#allocation24_spill] sm:$0xff] %v2862_v2  ;;  %vm4140_vm14 = vcmp.lt.s32.totalorder %v2862_v2, 600 }
  0x5e   : > { %2424 = vmatmul.mubr.msk.f32.gmra.mxu0 %vm316_vm1, %v286_v59 }
  0x5f   : > { %2426 = vmatprep.mubr.msk.f32.mxu0 %vm316_vm1, %v287_v60  ;;  %v2848_v60 = vadd.s32 %v2728_v5, %v912_v51 }
  0x61   : > { %4308 = vst [vmem:[#allocation21_spill] sm:$0xff] %v2848_v60  ;;  %vm4142_vm12 = vcmp.lt.s32.totalorder %v2848_v60, 600 }
  0x62   : > { %2427 = vmatmul.mubr.msk.f32.gmra.mxu0 %vm316_vm1, %v288_v61  ;;  %v914_v61 = vadd.s32 152, %v2724_v3 }
  0x63   : > { %2429 = vmatprep.mubr.msk.f32.mxu0 %vm316_vm1, %v289_v62 }
  0x66   : > { %2430 = vmatmul.mubr.msk.f32.gmra.mxu0 %vm316_vm1, %v290_v63  ;;  %v2857_v63 = vadd.s32 %v2728_v5, %v903_v54 }
  0x67   : > { %2432 = vmatprep.mubr.msk.f32.mxu0 %vm316_vm1, %v291_v0  ;;  %v906_v0 = vadd.s32 88, %v2724_v3 }
  0x68   : > { %4310 = vst [vmem:[#allocation23_spill] sm:$0xff] %v2857_v63  ;;  %vm4188_vm13 = vcmp.lt.s32.totalorder %v2857_v63, 600 }
  0x6a   : > { %2433 = vmatmul.mubr.msk.f32.gmra.mxu0 %vm316_vm1, %v292_v1 }
  0xda   : > { %v2374_v9 = vpop.f32.mrf.mxu0 }
  0xdb   : > { %v2746_v12 = vsel %vm4141_vm2, %v2374_v9, 0.0 }
  0xdc   : > { %4296 = vst [vmem:[#allocation9_spill] sm:$0xff] %v2746_v12  ;;  %v575_v13 = vpop.f32.mrf.mxu0  ;;  %v1346_v14 = vmul.f32 %v2746_v12, %v2746_v12  ;;  %v2772_v25 = vpop.f32.mrf.mxu1 }
  0xdd   : > { %v2752_v15 = vsel %vm4139_vm3, %v575_v13, 0.0  ;;  %vm4221_vm3 = vcmp.lt.s32.totalorder %v2910_v37, 600 }
  0xde   : > { %4297 = vst [vmem:[#allocation10_spill] sm:$0xff] %v2752_v15  ;;  %1475 = vrot.lane.b32.xlu1 %v1346_v14, %s2537_s29  ;;  %v2377_v16 = vpop.f32.mrf.mxu0  ;;  %v1345_v19 = vmul.f32 %v2752_v15, %v2752_v15  ;;  %v2786_v32 = vpop.f32.mrf.mxu1  ;;  %v2878_v14 = vadd.s32 %v2728_v5, %v914_v61 }
  0xdf   : > { %v2764_v21 = vsel %vm4148_vm4, %v2377_v16, 0.0 }
  0xe0   : > { %v585_v20 = vpop.f32.mrf.mxu0  ;;  %4299 = vst [vmem:[#allocation12_spill] sm:$0xff] %v2764_v21  ;;  %v1348_v26 = vmul.f32 %v2764_v21, %v2764_v21  ;;  %v2800_v39 = vpop.f32.mrf.mxu1  ;;  %4312 = vst [vmem:[#allocation25_spill] sm:$0xff] %v2878_v14  ;;  %vm4151_vm15 = vcmp.lt.s32.totalorder %v2878_v14, 600 }
  0xe1   : > { %v2778_v28 = vsel %vm4144_vm5, %v585_v20, 0.0 }
  0xe2   : > { %1473 = vrot.lane.b32.xlu1 %v1345_v19, %s2537_s29  ;;  %v2380_v22 = vpop.f32.mrf.mxu0  ;;  %4301 = vst [vmem:[#allocation14_spill] sm:$0xff] %v2778_v28  ;;  %v1347_v33 = vmul.f32 %v2778_v28, %v2778_v28  ;;  %v2817_v47 = vpop.f32.mrf.mxu1  ;;  %v2887_v19 = vadd.s32 %v2728_v5, %v906_v0  ;;  %v907_v0 = vadd.s32 96, %v2724_v3 }
  0xe3   : > { %v2792_v35 = vsel %vm4166_vm6, %v2380_v22, 0.0  ;;  %v913_v22 = vadd.s32 144, %v2724_v3 }
  0xe4   : > { %v595_v27 = vpop.f32.mrf.mxu0  ;;  %4303 = vst [vmem:[#allocation16_spill] sm:$0xff] %v2792_v35  ;;  %v1350_v40 = vmul.f32 %v2792_v35, %v2792_v35  ;;  %v2840_v57 = vpop.f32.mrf.mxu1  ;;  %vm1036_vm0 = vcmp.lt.s32.totalorder %v2887_v19, 600  ;;  %v921_v35 = vadd.s32 208, %v2724_v3 }
  0xe5   : > { %v2807_v43 = vsel %vm4157_vm7, %v595_v27, 0.0  ;;  %v2921_v45 = vadd.s32 %v2728_v5, %v913_v22 }
  0xe6   : > { %1479 = vrot.lane.b32.xlu1 %v1348_v26, %s2537_s29  ;;  %v2383_v30 = vpop.f32.mrf.mxu0  ;;  %4305 = vst [vmem:[#allocation18_spill] sm:$0xff] %v2807_v43  ;;  %v1349_v48 = vmul.f32 %v2807_v43, %v2807_v43  ;;  %v2864_v4 = vpop.f32.mrf.mxu1 }
  0xe7   : > { %v2829_v52 = vsel %vm4177_vm8, %v2383_v30, 0.0  ;;  %4316 = vst [vmem:[#allocation29_spill] sm:$0xff] %v2921_v45 }
  0xe8   : > { %v605_v34 = vpop.f32.mrf.mxu0  ;;  %4307 = vst [vmem:[#allocation20_spill] sm:$0xff] %v2829_v52  ;;  %v1352_v58 = vmul.f32 %v2829_v52, %v2829_v52  ;;  %v2893_v24 = vpop.f32.mrf.mxu1 }
  0xe9   : > { %v2853_v62 = vsel %vm4171_vm9, %v605_v34, 0.0 }
  0xea   : > { %1477 = vrot.lane.b32.xlu1 %v1347_v33, %s2537_s29  ;;  %v2386_v38 = vpop.f32.mrf.mxu0  ;;  %4309 = vst [vmem:[#allocation22_spill] sm:$0xff] %v2853_v62  ;;  %v1351_v9 = vmul.f32 %v2853_v62, %v2853_v62  ;;  %v916_v33 = vadd.s32 168, %v2724_v3  ;;  %v3130_v62 = vadd.s32 %v2728_v5, %v921_v35 }
  0xeb   : > { %v2882_v16 = vsel %vm4200_vm11, %v2386_v38, 0.0 }
  0xec   : > { %v615_v41 = vpop.f32.mrf.mxu0  ;;  %v1354_v27 = vmul.f32 %v2882_v16, %v2882_v16 }
  0xed   : > { %v2907_v34 = vsel %vm4188_vm13, %v615_v41, 0.0  ;;  %v2923_v41 = vpop.f32.mrf.mxu1 }
  0xee   : > { %1483 = vrot.lane.b32.xlu1 %v1350_v40, %s2537_s29  ;;  %v2815_v46 = vpop.f32.mrf.mxu0  ;;  %4314 = vst [vmem:[#allocation27_spill] sm:$0xff] %v2907_v34  ;;  %v908_v40 = vadd.s32 104, %v2724_v3  ;;  %v1353_v51 = vmul.f32 %v2907_v34, %v2907_v34 }
  0xef   : > { %v2939_v61 = vsel %vm1036_vm0, %v2815_v46, 0.0  ;;  %v915_v46 = vadd.s32 160, %v2724_v3  ;;  %v2952_v18 = vpop.f32.mrf.mxu1 }
  0xf0   : > { %v2821_v49 = vpop.f32.mrf.mxu0 }
  0xf2   : > { %1481 = vrot.lane.b32.xlu1 %v1349_v48, %s2537_s29  ;;  %v2837_v55 = vpop.f32.mrf.mxu0 }
  0xf4   : > { %v2844_v59 = vpop.f32.mrf.mxu0 }
  0xf6   : > { %1487 = vrot.lane.b32.xlu1 %v1352_v58, %s2537_s29  ;;  %v2395_v1 = vpop.f32.mrf.mxu0  ;;  %v2934_v58 = vadd.s32 %v2728_v5, %v916_v33 }
  0xf7   : > { %v2868_v8 = vsel %vm1040_vm10, %v2395_v1, 0.0  ;;  %v2944_v1 = vadd.s32 %v2728_v5, %v908_v40  ;;  %v909_v40 = vadd.s32 112, %v2724_v3 }
  0xf8   : > { %v2872_v11 = vpop.f32.mrf.mxu0  ;;  %v1360_v13 = vmul.f32 %v2868_v8, %v2868_v8  ;;  %4318 = vst [vmem:[#allocation31_spill] sm:$0xff] %v2934_v58  ;;  %vm4169_vm2 = vcmp.lt.s32.totalorder %v2934_v58, 600  ;;  %v924_v58 = vadd.s32 232, %v2724_v3 }
  0xfa   : > { %1485 = vrot.lane.b32.xlu1 %v1351_v9, %s2537_s29  ;;  %1503 = vrot.lane.b32.xlu0 %v1360_v13, %s2537_s29  ;;  %v2398_v20 = vpop.f32.mrf.mxu0 }
  0xfb   : > { %v2897_v26 = vsel %vm4142_vm12, %v2398_v20, 0.0  ;;  %v1356_v20 = vmul.f32 %v2939_v61, %v2939_v61  ;;  %vm1038_vm12 = vcmp.lt.s32.totalorder %v2944_v1, 600 }
  0xfc   : > { %4313 = vst [vmem:[#allocation26_spill] sm:$0xff] %v2897_v26  ;;  %v1362_v30 = vmul.f32 %v2897_v26, %v2897_v26  ;;  %v655_v31 = vpop.f32.mrf.mxu0  ;;  %v925_v26 = vadd.s32 240, %v2724_v3 }
  0xfd   : > { %v2914_v38 = vsel %vm4140_vm14, %v655_v31, 0.0  ;;  %vm4145_vm14 = vcmp.lt.s32.totalorder %v2921_v45, 600  ;;  %v2964_v31 = vadd.s32 %v2728_v5, %v907_v0 }
  0xfe   : > { %4315 = vst [vmem:[#allocation28_spill] sm:$0xff] %v2914_v38  ;;  %1491 = vrot.lane.b32.xlu1 %v1354_v27, %s2537_s29  ;;  %1507 = vrot.lane.b32.xlu0 %v1362_v30, %s2537_s29  ;;  %v2401_v42 = vpop.f32.mrf.mxu0  ;;  %v1361_v54 = vmul.f32 %v2914_v38, %v2914_v38  ;;  %v918_v27 = vadd.s32 184, %v2724_v3  ;;  %v2961_v30 = vsel %vm4221_vm3, %v2821_v49, 0.0  ;;  %v3057_v45 = vadd.s32 %v2728_v5, %v925_v26 }
  0xff   : > { %v2927_v48 = vsel %vm4151_vm15, %v2401_v42, 0.0  ;;  %v2973_v42 = vadd.s32 %v2728_v5, %v915_v46  ;;  %vm1037_vm5 = vcmp.lt.s32.totalorder %v2964_v31, 600 }
 0x100   : > { %4317 = vst [vmem:[#allocation30_spill] sm:$0xff] %v2927_v48  ;;  %v665_v56 = vpop.f32.mrf.mxu0  ;;  %v1364_v9 = vmul.f32 %v2927_v48, %v2927_v48  ;;  %v2988_v46 = vadd.s32 %v2728_v5, %v918_v27  ;;  %v3014_v12 = vsel %vm1037_vm5, %v2844_v59, 0.0  ;;  %vm1055_vm6 = vcmp.lt.s32.totalorder %v3057_v45, 600 }
 0x101   : > { %v2968_v33 = vsel %vm4145_vm14, %v665_v56, 0.0  ;;  %4320 = vst [vmem:[#allocation33_spill] sm:$0xff] %v2973_v42  ;;  %v1355_v56 = vmul.f32 %v2961_v30, %v2961_v30  ;;  %vm4161_vm14 = vcmp.lt.s32.totalorder %v2973_v42, 600 }
 0x102   : > { %1489 = vrot.lane.b32.xlu1 %v1353_v51, %s2537_s29  ;;  %1505 = vrot.lane.b32.xlu0 %v1361_v54, %s2537_s29  ;;  %v2404_v13 = vpop.f32.mrf.mxu0  ;;  %4319 = vst [vmem:[#allocation32_spill] sm:$0xff] %v2968_v33  ;;  %v2977_v51 = vpop.f32.mrf.mxu1  ;;  %v1363_v0 = vmul.f32 %v2968_v33, %v2968_v33  ;;  %4322 = vst [vmem:[#allocation35_spill] sm:$0xff] %v2988_v46  ;;  %vm4183_vm4 = vcmp.lt.s32.totalorder %v2988_v46, 600 }
 0x103   : > { %v2981_v54 = vsel %vm4169_vm2, %v2404_v13, 0.0  ;;  %v2997_v13 = vadd.s32 %v2728_v5, %v909_v40 }
 0x104   : > { %v675_v22 = vpop.f32.mrf.mxu0  ;;  %4321 = vst [vmem:[#allocation34_spill] sm:$0xff] %v2981_v54  ;;  %v3005_v38 = vpop.f32.mrf.mxu1 }
 0x105   : > { %vm1039_vm15 = vcmp.lt.s32.totalorder %v2997_v13, 600 }
 0x106   : > { %1495 = vrot.lane.b32.xlu1 %v1356_v20, %s2537_s29  ;;  %1511 = vrot.lane.b32.xlu0 %v1364_v9, %s2537_s29  ;;  %v2407_v49 = vpop.f32.mrf.mxu0  ;;  %v2993_v9 = vsel %vm1038_vm12, %v2837_v55, 0.0  ;;  %v1366_v20 = vmul.f32 %v2981_v54, %v2981_v54  ;;  %v920_v55 = vadd.s32 200, %v2724_v3  ;;  %v3027_v60 = vpop.f32.mrf.mxu1  ;;  %v3046_v17 = vsel %vm1039_vm15, %v2872_v11, 0.0 }
 0x107   : > { %v1358_v40 = vmul.f32 %v2993_v9, %v2993_v9  ;;  %v3031_v59 = vsel %vm4183_vm4, %v2407_v49, 0.0  ;;  %v1359_v11 = vmul.f32 %v3046_v17, %v3046_v17  ;;  %vm1051_vm4 = vcmp.lt.s32.totalorder %v3130_v62, 600 }
 0x108   : > { %v685_v15 = vpop.f32.mrf.mxu0  ;;  %4325 = vst [vmem:[#allocation38_spill] sm:$0xff] %v3031_v59  ;;  %v1368_v49 = vmul.f32 %v3031_v59, %v3031_v59  ;;  %v3059_v21 = vpop.f32.mrf.mxu1 }
 0x10a   : > { %1493 = vrot.lane.b32.xlu1 %v1355_v56, %s2537_s29  ;;  %1509 = vrot.lane.b32.xlu0 %v1363_v0, %s2537_s29  ;;  %v2410_v27 = vpop.f32.mrf.mxu0  ;;  %v3018_v56 = vsel %vm4161_vm14, %v675_v22, 0.0  ;;  %v3022_v0 = vadd.s32 %v2728_v5, %v917_v7  ;;  %v3034_v22 = vadd.s32 %v2728_v5, %v920_v55  ;;  %v1357_v7 = vmul.f32 %v3014_v12, %v3014_v12  ;;  %v3083_v29 = vpop.f32.mrf.mxu1 }
 0x10b   : > { %4323 = vst [vmem:[#allocation36_spill] sm:$0xff] %v3018_v56  ;;  %v919_v55 = vadd.s32 192, %v2724_v3 }
 0x10c   : > { %v695_v2 = vpop.f32.mrf.mxu0  ;;  %4324 = vst [vmem:[#allocation37_spill] sm:$0xff] %v3022_v0  ;;  %vm4174_vm7 = vcmp.lt.s32.totalorder %v3022_v0, 600  ;;  %vm4205_vm14 = vcmp.lt.s32.totalorder %v3034_v22, 600  ;;  %v3110_v23 = vpop.f32.mrf.mxu1  ;;  %v3177_v0 = vadd.s32 %v2728_v5, %v938_v44 }
 0x10d   : > { %v3073_v26 = vsel %vm4174_vm7, %v685_v15, 0.0  ;;  %v3076_v14 = vadd.s32 %v2728_v5, %v919_v55  ;;  %v940_v15 = vadd.s32 360, %v2724_v3 }
 0x10e   : > { %1499 = vrot.lane.b32.xlu1 %v1358_v40, %s2537_s29  ;;  %1515 = vrot.lane.b32.xlu0 %v1366_v20, %s2537_s29  ;;  %v2413_v6 = vpop.f32.mrf.mxu0  ;;  %v1365_v40 = vmul.f32 %v3018_v56, %v3018_v56  ;;  %v942_v20 = vadd.s32 376, %v2724_v3  ;;  %4327 = vst [vmem:[#allocation40_spill] sm:$0xff] %v3073_v26  ;;  %v1367_v55 = vmul.f32 %v3073_v26, %v3073_v26  ;;  %4336 = vst [vmem:[#allocation49_spill] sm:$0xff] %v3177_v0 }
 0x10f   : > { %4328 = vst [vmem:[#allocation41_spill] sm:$0xff] %v3076_v14  ;;  %v3093_v56 = vadd.s32 %v2728_v5, %v922_v10  ;;  %vm4199_vm9 = vcmp.lt.s32.totalorder %v3076_v14, 600  ;;  %v3120_v54 = vadd.s32 %v2728_v5, %v940_v15  ;;  %v3135_v15 = vpop.f32.mrf.mxu1 }
 0x110   : > { %v3040_v28 = vpop.f32.mrf.mxu0 }
 0x111   : > { %vm1052_vm7 = vcmp.lt.s32.totalorder %v3093_v56, 600  ;;  %4331 = vst [vmem:[#allocation44_spill] sm:$0xff] %v3120_v54  ;;  %v3166_v26 = vpop.f32.mrf.mxu1 }
 0x112   : > { %1497 = vrot.lane.b32.xlu1 %v1357_v7, %s2537_s29  ;;  %1513 = vrot.lane.b32.xlu0 %v1365_v40, %s2537_s29  ;;  %v3054_v33 = vpop.f32.mrf.mxu0  ;;  %v3068_v7 = vadd.s32 %v2728_v5, %v942_v20  ;;  %v941_v40 = vadd.s32 368, %v2724_v3  ;;  %v3087_v20 = vsel %vm4205_vm14, %v2410_v27, 0.0 }
 0x113   : > { %v1370_v27 = vmul.f32 %v3087_v20, %v3087_v20  ;;  %v3194_v44 = vpop.f32.mrf.mxu1 }
 0x114   : > { %v3065_v48 = vpop.f32.mrf.mxu0  ;;  %4326 = vst [vmem:[#allocation39_spill] sm:$0xff] %v3068_v7  ;;  %vm4181_vm2 = vcmp.lt.s32.totalorder %v3068_v7, 600 }
 0x116   : > { %1501 = vrot.lane.b32.xlu1 %v1359_v11, %s2537_s29  ;;  %1519 = vrot.lane.b32.xlu0 %v1368_v49, %s2537_s29  ;;  %v3080_v43 = vpop.f32.mrf.mxu0  ;;  %v3097_v11 = vadd.s32 %v2728_v5, %v941_v40  ;;  %v939_v40 = vadd.s32 352, %v2724_v3 }
 0x118   : > { %v725_v49 = vpop.f32.mrf.mxu0  ;;  %4329 = vst [vmem:[#allocation42_spill] sm:$0xff] %v3097_v11  ;;  %vm4187_vm8 = vcmp.lt.s32.totalorder %v3097_v11, 600 }
 0x119   : > { %v3101_v42 = vsel %vm1055_vm6, %v725_v49, 0.0  ;;  %v3116_v49 = vsel %vm4181_vm2, %v2840_v57, 0.0  ;;  %v3147_v35 = vsel %vm4187_vm8, %v2864_v4, 0.0  ;;  %vm4193_vm2 = vcmp.lt.s32.totalorder %v3120_v54, 600 }
 0x11a   : > { %v1375_v10 = vmul.f32 %v3101_v42, %v3101_v42  ;;  %1517 = vrot.lane.b32.xlu0 %v1367_v55, %s2537_s29  ;;  %4330 = vst [vmem:[#allocation43_spill] sm:$0xff] %v3116_v49  ;;  %v3127_v55 = vsel %vm4199_vm9, %v695_v2, 0.0  ;;  %v1392_v57 = vmul.f32 %v3116_v49, %v3116_v49  ;;  %v3137_v7 = vpop.f32.mrf.mxu0  ;;  %4333 = vst [vmem:[#allocation46_spill] sm:$0xff] %v3147_v35  ;;  %v923_v4 = vadd.s32 224, %v2724_v3 }
 0x11b   : > { %4332 = vst [vmem:[#allocation45_spill] sm:$0xff] %v3127_v55  ;;  %v1369_v2 = vmul.f32 %v3127_v55, %v3127_v55  ;;  %v3156_v49 = vadd.s32 %v2728_v5, %v939_v40  ;;  %v1391_v11 = vmul.f32 %v3147_v35, %v3147_v35  ;;  %v937_v40 = vadd.s32 336, %v2724_v3 }
 0x11c   : > { %1533 = vrot.lane.b32.xlu1 %v1375_v10, %s2537_s29  ;;  %v3142_v10 = vsel %vm1052_vm7, %v2413_v6, 0.0  ;;  %v3186_v35 = vsel %vm1051_vm4, %v3040_v28, 0.0  ;;  %v3191_v54 = vadd.s32 %v2728_v5, %v923_v4 }
 0x11d   : > { %4334 = vst [vmem:[#allocation47_spill] sm:$0xff] %v3156_v49  ;;  %v1372_v6 = vmul.f32 %v3142_v10, %v3142_v10  ;;  %vm4196_vm13 = vcmp.lt.s32.totalorder %v3156_v49, 600  ;;  %v3227_v49 = vpop.f32.mrf.mxu1 }
 0x11e   : > { %1523 = vrot.lane.b32.xlu0 %v1370_v27, %s2537_s29  ;;  %v3153_v27 = vadd.s32 %v2728_v5, %v924_v58  ;;  %v3168_v58 = vpop.f32.mrf.mxu0  ;;  %v3210_v4 = vsel %vm4196_vm13, %v2817_v47, 0.0  ;;  %vm1053_vm13 = vcmp.lt.s32.totalorder %v3191_v54, 600 }
 0x11f   : > { %4338 = vst [vmem:[#allocation51_spill] sm:$0xff] %v3210_v4  ;;  %v1389_v47 = vmul.f32 %v3210_v4, %v3210_v4  ;;  %v3248_v4 = vsel %vm1053_vm13, %v3065_v48, 0.0  ;;  %v3257_v34 = vpop.f32.mrf.mxu1 }
 0x120   : > { %1567 = vrot.lane.b32.xlu1 %v1392_v57, %s2537_s29  ;;  %v3174_v57 = vsel %vm4193_vm2, %v2800_v39, 0.0  ;;  %vm1054_vm8 = vcmp.lt.s32.totalorder %v3153_v27, 600  ;;  %v3196_v52 = vpop.f32.mrf.mxu0  ;;  %vm4204_vm2 = vcmp.lt.s32.totalorder %v3177_v0, 600 }
 0x121   : > { %4335 = vst [vmem:[#allocation48_spill] sm:$0xff] %v3174_v57  ;;  %v1390_v39 = vmul.f32 %v3174_v57, %v3174_v57  ;;  %v3205_v28 = vsel %vm1054_vm8, %v3054_v33, 0.0  ;;  %v931_v33 = vadd.s32 288, %v2724_v3  ;;  %v3237_v46 = vsel %vm4204_vm2, %v2772_v25, 0.0 }
 0x122   : > { %1521 = vrot.lane.b32.xlu0 %v1369_v2, %s2537_s29  ;;  %v926_v2 = vadd.s32 248, %v2724_v3  ;;  %v1374_v59 = vmul.f32 %v3205_v28, %v3205_v28  ;;  %4340 = vst [vmem:[#allocation53_spill] sm:$0xff] %v3237_v46  ;;  %v957_v25 = vadd.s32 496, %v2724_v3  ;;  %v1388_v0 = vmul.f32 %v3237_v46, %v3237_v46 }
 0x123   : > { %v956_v46 = vadd.s32 488, %v2724_v3 }
 0x124   : > { %1565 = vrot.lane.b32.xlu1 %v1391_v11, %s2537_s29  ;;  %v3200_v11 = vadd.s32 %v2728_v5, %v937_v40  ;;  %v3216_v57 = vadd.s32 %v2728_v5, %v926_v2  ;;  %v958_v40 = vadd.s32 504, %v2724_v3  ;;  %v3229_v2 = vpop.f32.mrf.mxu0 }
 0x126   : > { %1527 = vrot.lane.b32.xlu0 %v1372_v6, %s2537_s29  ;;  %4337 = vst [vmem:[#allocation50_spill] sm:$0xff] %v3200_v11  ;;  %v1371_v6 = vmul.f32 %v3186_v35, %v3186_v35  ;;  %vm4208_vm9 = vcmp.lt.s32.totalorder %v3200_v11, 600  ;;  %vm1056_vm11 = vcmp.lt.s32.totalorder %v3216_v57, 600 }
 0x127   : > { %v3264_v48 = vsel %vm4208_vm9, %v2786_v32, 0.0  ;;  %v3282_v32 = vadd.s32 %v2728_v5, %v957_v25 }
 0x128   : > { %1563 = vrot.lane.b32.xlu1 %v1390_v39, %s2537_s29  ;;  %v3232_v39 = vadd.s32 %v2728_v5, %v932_v36  ;;  %v3251_v36 = vadd.s32 %v2728_v5, %v931_v33  ;;  %4343 = vst [vmem:[#allocation56_spill] sm:$0xff] %v3264_v48  ;;  %v3269_v33 = vsel %vm1056_vm11, %v3080_v43, 0.0  ;;  %v1387_v43 = vmul.f32 %v3264_v48, %v3264_v48 }
 0x129   : > { %4345 = vst [vmem:[#allocation58_spill] sm:$0xff] %v3282_v32  ;;  %v1376_v11 = vmul.f32 %v3269_v33, %v3269_v33  ;;  %v3301_v48 = vadd.s32 %v2728_v5, %v956_v46 }
 0x12a   : > { %1525 = vrot.lane.b32.xlu0 %v1371_v6, %s2537_s29  ;;  %4339 = vst [vmem:[#allocation52_spill] sm:$0xff] %v3232_v39  ;;  %v3243_v6 = vadd.s32 %v2728_v5, %v958_v40  ;;  %4342 = vst [vmem:[#allocation55_spill] sm:$0xff] %v3251_v36  ;;  %vm4214_vm2 = vcmp.lt.s32.totalorder %v3232_v39, 600  ;;  %v934_v40 = vadd.s32 312, %v2724_v3  ;;  %vm4220_vm9 = vcmp.lt.s32.totalorder %v3251_v36, 600 }
 0x12b   : > { %4348 = vst [vmem:[#allocation61_spill] sm:$0xff] %v3301_v48  ;;  %v954_v36 = vadd.s32 472, %v2724_v3 }
 0x12c   : > { %1561 = vrot.lane.b32.xlu1 %v1389_v47, %s2537_s29  ;;  %4341 = vst [vmem:[#allocation54_spill] sm:$0xff] %v3243_v6  ;;  %v2428_v47 = vpop.f32.mrf.mxu0  ;;  %vm4216_vm14 = vcmp.lt.s32.totalorder %v3243_v6, 600  ;;  %v3290_v14 = vadd.s32 %v2728_v5, %v934_v40 }
 0x12d   : > { %v3278_v63 = vsel %vm4214_vm2, %v2428_v47, 0.0  ;;  %v933_v47 = vadd.s32 304, %v2724_v3  ;;  %vm4227_vm2 = vcmp.lt.s32.totalorder %v3282_v32, 600 }
 0x12e   : > { %1531 = vrot.lane.b32.xlu0 %v1374_v59, %s2537_s29  ;;  %v1373_v59 = vmul.f32 %v3248_v4, %v3248_v4  ;;  %4344 = vst [vmem:[#allocation57_spill] sm:$0xff] %v3278_v63  ;;  %v755_v55 = vpop.f32.mrf.mxu0  ;;  %4346 = vst [vmem:[#allocation59_spill] sm:$0xff] %v3290_v14  ;;  %v1382_v25 = vmul.f32 %v3278_v63, %v3278_v63  ;;  %v936_v63 = vadd.s32 328, %v2724_v3 }
 0x12f   : > { %v3306_v40 = vsel %vm4220_vm9, %v755_v55, 0.0  ;;  %v3314_v46 = vadd.s32 %v2728_v5, %v933_v47  ;;  %vm4232_vm9 = vcmp.lt.s32.totalorder %v3301_v48, 600 }
 0x130   : > { %1559 = vrot.lane.b32.xlu1 %v1388_v0, %s2537_s29  ;;  %v2467_v0 = vpop.f32.mrf.mxu1  ;;  %4349 = vst [vmem:[#allocation62_spill] sm:$0xff] %v3306_v40  ;;  %v2431_v6 = vpop.f32.mrf.mxu0  ;;  %v1381_v55 = vmul.f32 %v3306_v40, %v3306_v40  ;;  %v3336_v40 = vadd.s32 %v2728_v5, %v936_v63  ;;  %v3351_v63 = vsel %vm4232_vm9, %v3227_v49, 0.0 }
 0x131   : > { %v3295_v39 = vsel %vm4216_vm14, %v2467_v0, 0.0  ;;  %vm4226_vm14 = vcmp.lt.s32.totalorder %v3290_v14, 600  ;;  %4350 = vst [vmem:[#allocation63_spill] sm:$0xff] %v3314_v46  ;;  %vm4230_vm3 = vcmp.lt.s32.totalorder %v3314_v46, 600  ;;  %v3345_v14 = vadd.s32 %v2728_v5, %v954_v36  ;;  %4356 = vst [vmem:[#allocation69_spill] sm:$0xff] %v3351_v63 }
 0x132   : > { %1529 = vrot.lane.b32.xlu0 %v1373_v59, %s2537_s29  ;;  %4347 = vst [vmem:[#allocation60_spill] sm:$0xff] %v3295_v39  ;;  %v955_v59 = vadd.s32 480, %v2724_v3  ;;  %v1408_v0 = vmul.f32 %v3295_v39, %v3295_v39  ;;  %v3330_v47 = vsel %vm4226_vm14, %v2431_v6, 0.0  ;;  %4354 = vst [vmem:[#allocation67_spill] sm:$0xff] %v3336_v40  ;;  %v1406_v49 = vmul.f32 %v3351_v63, %v3351_v63 }
 0x133   : > { %4353 = vst [vmem:[#allocation66_spill] sm:$0xff] %v3330_v47  ;;  %v1384_v6 = vmul.f32 %v3330_v47, %v3330_v47  ;;  %4355 = vst [vmem:[#allocation68_spill] sm:$0xff] %v3345_v14  ;;  %v952_v46 = vadd.s32 456, %v2724_v3 }
 0x134   : > { %1557 = vrot.lane.b32.xlu1 %v1387_v43, %s2537_s29  ;;  %v885_v43 = vpop.f32.mrf.mxu1  ;;  %v3322_v39 = vadd.s32 %v2728_v5, %v955_v59  ;;  %v935_v59 = vadd.s32 320, %v2724_v3 }
 0x136   : > { %1535 = vrot.lane.b32.xlu0 %v1376_v11, %s2537_s29  ;;  %4351 = vst [vmem:[#allocation64_spill] sm:$0xff] %v3322_v39  ;;  %v3326_v11 = vsel %vm4227_vm2, %v885_v43, 0.0  ;;  %vm4236_vm14 = vcmp.lt.s32.totalorder %v3322_v39, 600  ;;  %vm4235_vm2 = vcmp.lt.s32.totalorder %v3336_v40, 600  ;;  %v3362_v36 = vadd.s32 %v2728_v5, %v935_v59 }
 0x137   : > { %4352 = vst [vmem:[#allocation65_spill] sm:$0xff] %v3326_v11  ;;  %v1407_v43 = vmul.f32 %v3326_v11, %v3326_v11  ;;  %v930_v11 = vadd.s32 280, %v2724_v3  ;;  %v951_v40 = vadd.s32 448, %v2724_v3  ;;  %v3405_v39 = vadd.s32 %v2728_v5, %v952_v46 }
 0x138   : > { %1547 = vrot.lane.b32.xlu1 %v1382_v25, %s2537_s29  ;;  %v765_v25 = vpop.f32.mrf.mxu0  ;;  %4358 = vst [vmem:[#allocation71_spill] sm:$0xff] %v3362_v36  ;;  %vm4242_vm9 = vcmp.lt.s32.totalorder %v3362_v36, 600 }
 0x139   : > { %v3355_v32 = vsel %vm4230_vm3, %v765_v25, 0.0  ;;  %vm4243_vm3 = vcmp.lt.s32.totalorder %v3345_v14, 600  ;;  %4365 = vst [vmem:[#allocation78_spill] sm:$0xff] %v3405_v39  ;;  %v950_v14 = vadd.s32 440, %v2724_v3 }
 0x13a   : > { %1599 = vrot.lane.b32.xlu0 %v1408_v0, %s2537_s29  ;;  %v953_v0 = vadd.s32 464, %v2724_v3  ;;  %4357 = vst [vmem:[#allocation70_spill] sm:$0xff] %v3355_v32  ;;  %v1383_v25 = vmul.f32 %v3355_v32, %v3355_v32 }
 0x13c   : > { %1545 = vrot.lane.b32.xlu1 %v1381_v55, %s2537_s29  ;;  %v2434_v55 = vpop.f32.mrf.mxu0  ;;  %v3381_v59 = vadd.s32 %v2728_v5, %v953_v0 }
 0x13d   : > { %v3377_v47 = vsel %vm4235_vm2, %v2434_v55, 0.0 }
 0x13e   : > { %1597 = vrot.lane.b32.xlu0 %v1407_v43, %s2537_s29  ;;  %v3373_v43 = vsel %vm4236_vm14, %v3257_v34, 0.0  ;;  %4360 = vst [vmem:[#allocation73_spill] sm:$0xff] %v3377_v47  ;;  %4361 = vst [vmem:[#allocation74_spill] sm:$0xff] %v3381_v59  ;;  %v775_v32 = vpop.f32.mrf.mxu0  ;;  %v929_v34 = vadd.s32 272, %v2724_v3  ;;  %v1386_v0 = vmul.f32 %v3377_v47, %v3377_v47  ;;  %vm1083_vm2 = vcmp.lt.s32.totalorder %v3381_v59, 600 }
 0x13f   : > { %4359 = vst [vmem:[#allocation72_spill] sm:$0xff] %v3373_v43  ;;  %v1405_v55 = vmul.f32 %v3373_v43, %v3373_v43  ;;  %v928_v47 = vadd.s32 264, %v2724_v3  ;;  %v3432_v43 = vsel %vm1083_vm2, %v3194_v44, 0.0  ;;  %v927_v44 = vadd.s32 256, %v2724_v3 }
 0x140   : > { %1551 = vrot.lane.b32.xlu1 %v1384_v6, %s2537_s29  ;;  %v3384_v6 = vadd.s32 %v2728_v5, %v930_v11  ;;  %v3398_v11 = vsel %vm4243_vm3, %v3166_v26, 0.0  ;;  %v3417_v26 = vld [vmem:[%s239_s25] sm:$0xf]  ;;  %v3422_v46 = vadd.s32 %v2728_v5, %v929_v34  ;;  %4368 = vst [vmem:[#allocation81_spill] sm:$0xff] %v3432_v43  ;;  %v3441_v34 = vadd.s32 %v2728_v5, %v951_v40 }
 0x141   : > { %4363 = vst [vmem:[#allocation76_spill] sm:$0xff] %v3398_v11  ;;  %4366 = vst [vmem:[#allocation79_spill] sm:$0xff] %v3417_v26 }
 0x142   : > { %4362 = vst [vmem:[#allocation75_spill] sm:$0xff] %v3384_v6  ;;  %1595 = vrot.lane.b32.xlu0 %v1406_v49, %s2537_s29  ;;  %v3402_v49 = vsel %vm4242_vm9, %v775_v32, 0.0  ;;  %vm4245_vm14 = vcmp.lt.s32.totalorder %v3384_v6, 600  ;;  %v1404_v32 = vmul.f32 %v3398_v11, %v3398_v11  ;;  %4367 = vst [vmem:[#allocation80_spill] sm:$0xff] %v3422_v46  ;;  %vm4246_vm9 = vcmp.lt.s32.totalorder %v3405_v39, 600 }
 0x143   : > { %4364 = vst [vmem:[#allocation77_spill] sm:$0xff] %v3402_v49  ;;  %v3437_v11 = vsel %vm4245_vm14, %v3196_v52, 0.0  ;;  %4370 = vst [vmem:[#allocation83_spill] sm:$0xff] %v3441_v34  ;;  %v1403_v52 = vmul.f32 %v3432_v43, %v3432_v43  ;;  %vm4247_vm14 = vcmp.lt.s32.totalorder %v3422_v46, 600  ;;  %v3459_v40 = vsel %vm4246_vm9, %v3110_v23, 0.0 }
 0x144   : > { %1549 = vrot.lane.b32.xlu1 %v1383_v25, %s2537_s29  ;;  %v1801_v25 = vsub.s32 1, %v2724_v3  ;;  %4369 = vst [vmem:[#allocation82_spill] sm:$0xff] %v3437_v11  ;;  %v1380_v6 = vmul.f32 %v3437_v11, %v3437_v11  ;;  %4372 = vst [vmem:[#allocation85_spill] sm:$0xff] %v3459_v40  ;;  %v3476_v23 = vadd.s32 %v2728_v5, %v927_v44  ;;  %v945_v11 = vadd.s32 400, %v2724_v3 }
 0x146   : > { %1593 = vrot.lane.b32.xlu0 %v1405_v55, %s2537_s29  ;;  %v1385_v55 = vmul.f32 %v3402_v49, %v3402_v49  ;;  %v1802_v36 = vrot.slane %v3417_v26, %v1801_v25  ;;  %v4248_v25 = vmov 1.0   ;;  %4375 = vst [vmem:[#allocation88_spill] sm:$0xff] %v3476_v23  ;;  %v2539_v26 = vmov 0.0  }
 0x147   : > { %v2170_v50 = vsel %vm1039_vm15, 1.0, %v2539_v26  ;;  %v2185_v45 = vsel %vm1054_vm8, 1.0, %v2539_v26  ;;  %v2169_v13 = vsel %vm1038_vm12, 1.0, %v2539_v26  ;;  %v2184_v27 = vsel %vm1053_vm13, 1.0, %v2539_v26 }
 0x148   : > { %1555 = vrot.lane.b32.xlu1 %v1386_v0, %s2537_s29  ;;  %vm1812_vm3 = vcmp.eq.s32.totalorder %v2724_v3, %v1802_v36  ;;  %v3446_v0 = vadd.s32 %v2728_v5, %v928_v47  ;;  %v3462_v47 = vadd.s32 %v2728_v5, %v950_v14  ;;  %v949_v36 = vadd.s32 432, %v2724_v3 }
 0x149   : > { %2224 = vmatprep.mubr.msk.f32.mxu1 %vm1812_vm3, %v4248_v25  ;;  %vm4250_vm3 = vcmp.lt.s32.totalorder %v3441_v34, 600  ;;  %v2168_v1 = vsel %vm1037_vm5, 1.0, %v2539_v26  ;;  %v2183_v54 = vsel %vm1052_vm7, 1.0, %v2539_v26  ;;  %v2167_v31 = vsel %vm1036_vm0, 1.0, %v2539_v26 }
 0x14a   : > { %1591 = vrot.lane.b32.xlu0 %v1404_v32, %s2537_s29  ;;  %4371 = vst [vmem:[#allocation84_spill] sm:$0xff] %v3446_v0  ;;  %4373 = vst [vmem:[#allocation86_spill] sm:$0xff] %v3462_v47  ;;  %v3470_v32 = vsel %vm4247_vm14, %v3229_v2, 0.0  ;;  %vm4252_vm9 = vcmp.lt.s32.totalorder %v3446_v0, 600  ;;  %v948_v2 = vadd.s32 424, %v2724_v3  ;;  %vm4256_vm14 = vcmp.lt.s32.totalorder %v3462_v47, 600 }
 0x14b   : > { %4374 = vst [vmem:[#allocation87_spill] sm:$0xff] %v3470_v32  ;;  %v3489_v25 = vadd.s32 %v2728_v5, %v949_v36  ;;  %v1379_v44 = vmul.f32 %v3470_v32, %v3470_v32  ;;  %v3508_v36 = vsel %vm4256_vm14, %v3059_v21, 0.0  ;;  %vm4403_vm5 = vcmp.lt.s32.totalorder %v2910_v37, 600 }
 0x14c   : > { %1553 = vrot.lane.b32.xlu1 %v1385_v55, %s2537_s29  ;;  %v1402_v55 = vmul.f32 %v3459_v40, %v3459_v40  ;;  %4381 = vst [vmem:[#allocation94_spill] sm:$0xff] %v3508_v36  ;;  %v1400_v21 = vmul.f32 %v3508_v36, %v3508_v36  ;;  %v2166_v19 = vsel %vm4403_vm5, 1.0, %v2539_v26 }
 0x14d   : > { %4378 = vst [vmem:[#allocation91_spill] sm:$0xff] %v3489_v25 }
 0x14e   : > { %1589 = vrot.lane.b32.xlu0 %v1403_v52, %s2537_s29  ;;  %v3484_v52 = vsel %vm4250_vm3, %v3135_v15, 0.0  ;;  %vm4259_vm3 = vcmp.lt.s32.totalorder %v3476_v23, 600 }
 0x14f   : > { %4377 = vst [vmem:[#allocation90_spill] sm:$0xff] %v3484_v52  ;;  %v1401_v15 = vmul.f32 %v3484_v52, %v3484_v52 }
 0x150   : > { %v3478_v14 = vpop.permute.xlu1 %1475  ;;  %1543 = vrot.lane.b32.xlu1 %v1380_v6, %s2537_s29  ;;  %v3497_v6 = vsel %vm4252_vm9, %v3137_v7, 0.0  ;;  %v947_v7 = vadd.s32 416, %v2724_v3  ;;  %vm1079_vm9 = vcmp.lt.s32.totalorder %v3489_v25, 600 }
 0x151   : > { %4376 = vst [vmem:[#allocation89_spill] sm:$0xff] %v3478_v14  ;;  %4379 = vst [vmem:[#allocation92_spill] sm:$0xff] %v3497_v6  ;;  %v1378_v0 = vmul.f32 %v3497_v6, %v3497_v6  ;;  %v946_v6 = vadd.s32 408, %v2724_v3  ;;  %v2187_v14 = vsel %vm1056_vm11, 1.0, %v2539_v26 }
 0x152   : > { %1587 = vrot.lane.b32.xlu0 %v1402_v55, %s2537_s29  ;;  %v3511_v55 = vadd.s32 %v2728_v5, %v948_v2  ;;  %v3531_v2 = vsel %vm1079_vm9, %v3083_v29, 0.0 }
 0x153   : > { %4384 = vst [vmem:[#allocation97_spill] sm:$0xff] %v3531_v2 }
 0x154   : > { %v3502_v46 = vpop.permute.xlu1 %1473  ;;  %1541 = vrot.lane.b32.xlu1 %v1379_v44, %s2537_s29  ;;  %4382 = vst [vmem:[#allocation95_spill] sm:$0xff] %v3511_v55  ;;  %v3521_v44 = vsel %vm4259_vm3, %v3168_v58, 0.0  ;;  %vm4261_vm14 = vcmp.lt.s32.totalorder %v3511_v55, 600  ;;  %v943_v55 = vadd.s32 384, %v2724_v3 }
 0x155   : > { %4380 = vst [vmem:[#allocation93_spill] sm:$0xff] %v3502_v46  ;;  %4383 = vst [vmem:[#allocation96_spill] sm:$0xff] %v3521_v44  ;;  %v1377_v58 = vmul.f32 %v3521_v44, %v3521_v44  ;;  %v3549_v29 = vsel %vm4261_vm14, %v3005_v38, 0.0  ;;  %v944_v38 = vadd.s32 392, %v2724_v3 }
 0x156   : > { %1585 = vrot.lane.b32.xlu0 %v1401_v15, %s2537_s29  ;;  %v3536_v15 = vadd.s32 %v2728_v5, %v947_v7  ;;  %4386 = vst [vmem:[#allocation99_spill] sm:$0xff] %v3549_v29  ;;  %v3552_v7 = vadd.s32 %v2728_v5, %v946_v6  ;;  %v3569_v6 = vadd.s32 %v2728_v5, %v945_v11 }
 0x158   : > { %v3525_v32 = vpop.permute.xlu1 %1479  ;;  %1539 = vrot.lane.b32.xlu1 %v1378_v0, %s2537_s29  ;;  %4385 = vst [vmem:[#allocation98_spill] sm:$0xff] %v3536_v15  ;;  %v1399_v0 = vmul.f32 %v3531_v2, %v3531_v2  ;;  %4387 = vst [vmem:[#allocation100_spill] sm:$0xff] %v3552_v7  ;;  %vm4265_vm3 = vcmp.lt.s32.totalorder %v3536_v15, 600  ;;  %vm4267_vm14 = vcmp.lt.s32.totalorder %v3552_v7, 600 }
 0x159   : > { %4389 = vst [vmem:[#allocation102_spill] sm:$0xff] %v3569_v6  ;;  %v3579_v15 = vsel %vm4267_vm14, %v2952_v18, 0.0  ;;  %v3598_v18 = vadd.s32 %v2728_v5, %v943_v55 }
 0x15a   : > { %1583 = vrot.lane.b32.xlu0 %v1400_v21, %s2537_s29  ;;  %v1398_v21 = vmul.f32 %v3549_v29, %v3549_v29  ;;  %4390 = vst [vmem:[#allocation103_spill] sm:$0xff] %v3579_v15  ;;  %v1396_v11 = vmul.f32 %v3579_v15, %v3579_v15 }
 0x15b   : > { %4393 = vst [vmem:[#allocation106_spill] sm:$0xff] %v3598_v18 }
 0x15c   : > { %v3543_v23 = vpop.permute.xlu1 %1477  ;;  %1537 = vrot.lane.b32.xlu1 %v1377_v58, %s2537_s29  ;;  %v3564_v58 = vsel %vm4265_vm3, %v3027_v60, 0.0  ;;  %v3582_v60 = vadd.s32 %v2728_v5, %v944_v38  ;;  %vm4270_vm3 = vcmp.lt.s32.totalorder %v3569_v6, 600 }
 0x15d   : > { %4388 = vst [vmem:[#allocation101_spill] sm:$0xff] %v3564_v58  ;;  %v3594_v7 = vsel %vm4270_vm3, %v2977_v51, 0.0  ;;  %vm4292_vm3 = vcmp.lt.s32.totalorder %v3598_v18, 600 }
 0x15e   : > { %1581 = vrot.lane.b32.xlu0 %v1399_v0, %s2537_s29  ;;  %v1397_v0 = vmul.f32 %v3564_v58, %v3564_v58  ;;  %4391 = vst [vmem:[#allocation104_spill] sm:$0xff] %v3582_v60  ;;  %4392 = vst [vmem:[#allocation105_spill] sm:$0xff] %v3594_v7  ;;  %vm1074_vm14 = vcmp.lt.s32.totalorder %v3582_v60, 600  ;;  %v1395_v38 = vmul.f32 %v3594_v7, %v3594_v7 }
 0x15f   : > { %v3608_v58 = vsel %vm1074_vm14, %v2893_v24, 0.0 }
 0x160   : > { %v3559_v44 = vpop.permute.xlu1 %1483  ;;  %4394 = vst [vmem:[#allocation107_spill] sm:$0xff] %v3608_v58  ;;  %v1394_v5 = vmul.f32 %v3608_v58, %v3608_v58 }
 0x162   : > { %1579 = vrot.lane.b32.xlu0 %v1398_v21, %s2537_s29 }
 0x164   : > { %v3574_v29 = vpop.permute.xlu1 %1481 }
 0x166   : > { %1577 = vrot.lane.b32.xlu0 %v1397_v0, %s2537_s29 }
 0x168   : > { %v3589_v21 = vpop.permute.xlu1 %1487 }
 0x16a   : > { %1575 = vrot.lane.b32.xlu0 %v1396_v11, %s2537_s29  ;;  %v3621_v11 = vsel %vm4292_vm3, %v2923_v41, 0.0  ;;  %vm1665_vm3 = vcmask 31744  }
 0x16b   : > { %4396 = vst [vmem:[#allocation109_spill] sm:$0xff] %v3621_v11  ;;  %v1393_v24 = vmul.f32 %v3621_v11, %v3621_v11 }
 0x16c   : > { %v3603_v0 = vpop.permute.xlu1 %1485  ;;  %v1504_v15 = vpop.permute.xlu0 %1503 }
 0x16e   : > { %1573 = vrot.lane.b32.xlu0 %v1395_v38, %s2537_s29 }
 0x170   : > { %v3614_v51 = vpop.permute.xlu1 %1491  ;;  %v3616_v55 = vpop.permute.xlu0 %1507 }
 0x171   : > { %4395 = vst [vmem:[#allocation108_spill] sm:$0xff] %v3616_v55 }
 0x172   : > { %1571 = vrot.lane.b32.xlu0 %v1394_v5, %s2537_s29 }
 0x174   : > { %v3626_v60 = vpop.permute.xlu1 %1489  ;;  %v3628_v38 = vpop.permute.xlu0 %1505 }
 0x175   : > { %4397 = vst [vmem:[#allocation110_spill] sm:$0xff] %v3628_v38 }
 0x176   : > { %1569 = vrot.lane.b32.xlu0 %v1393_v24, %s2537_s29 }
 0x178   : > { %v1496_v58 = vpop.permute.xlu1 %1495  ;;  %v3631_v7 = vpop.permute.xlu0 %1511 }
 0x17c   : > { %v3633_v6 = vpop.permute.xlu1 %1493  ;;  %v3635_v2 = vpop.permute.xlu0 %1509 }
 0x180   : > { %v1500_v41 = vpop.permute.xlu1 %1499  ;;  %v3637_v18 = vpop.permute.xlu0 %1515 }
 0x184   : > { %v1498_v5 = vpop.permute.xlu1 %1497  ;;  %v3639_v25 = vpop.permute.xlu0 %1513 }
 0x188   : > { %v3641_v11 = vpop.permute.xlu0 %1519  ;;  %v1502_v36 = vpop.permute.xlu1 %1501 }
 0x18c   : > { %v3643_v47 = vpop.permute.xlu0 %1517 }
 0x18e   : > { %v1534_v49 = vpop.permute.xlu1 %1533 }
 0x190   : > { %v1524_v24 = vpop.permute.xlu0 %1523 }
 0x192   : > { %v3645_v52 = vpop.permute.xlu1 %1567 }
 0x193   : > { %4398 = vst [vmem:[#allocation111_spill] sm:$0xff] %v3645_v52 }
 0x194   : > { %v3647_v34 = vpop.permute.xlu0 %1521 }
 0x196   : > { %v3649_v40 = vpop.permute.xlu1 %1565 }
 0x197   : > { %4399 = vst [vmem:[#allocation112_spill] sm:$0xff] %v3649_v40  ;;  %v2171_v40 = vsel %vm1040_vm10, 1.0, %v2539_v26 }
 0x198   : > { %v1528_v39 = vpop.permute.xlu0 %1527 }
 0x19a   : > { %v3651_v43 = vpop.permute.xlu1 %1563 }
 0x19b   : > { %4400 = vst [vmem:[#allocation113_spill] sm:$0xff] %v3651_v43  ;;  %v1681_v43 = vsel %vm1665_vm3, %v2868_v8, %v1504_v15  ;;  %v1680_v8 = vsel %vm1665_vm3, %v3046_v17, %v1502_v36 }
 0x19c   : > { %v1526_v59 = vpop.permute.xlu0 %1525 }
 0x19e   : > { %v3653_v63 = vpop.permute.xlu1 %1561 }
 0x19f   : > { %4401 = vst [vmem:[#allocation114_spill] sm:$0xff] %v3653_v63  ;;  %v2186_v63 = vsel %vm1055_vm6, 1.0, %v2539_v26  ;;  %vm4405_vm6 = vcmp.lt.s32.totalorder %v2833_v53, 600 }
 0x1a0   : > { %v1532_v48 = vpop.permute.xlu0 %1531  ;;  %v2165_v37 = vsel %vm4405_vm6, 1.0, %v2539_v26 }
 0x1a2   : > { %v3655_v46 = vpop.permute.xlu1 %1559 }
 0x1a3   : > { %4402 = vst [vmem:[#allocation115_spill] sm:$0xff] %v3655_v46  ;;  %v1696_v46 = vsel %vm1665_vm3, %v3101_v42, %v1534_v49  ;;  %v1695_v42 = vsel %vm1665_vm3, %v3205_v28, %v1532_v48  ;;  %v1745_v49 = vsel %vm316_vm1, %v1681_v43, %v2171_v40  ;;  %v1744_v48 = vsel %vm316_vm1, %v1680_v8, %v2170_v50  ;;  %v4412_v8 = vld [vmem:[#allocation35_spill] sm:$0xff] }
 0x1a4   : > { %v1530_v38 = vpop.permute.xlu0 %1529  ;;  %vm4413_vm10 = vcmp.lt.s32.totalorder %v4412_v8, 600 }
 0x1a5   : > { %v1694_v28 = vsel %vm1665_vm3, %v3248_v4, %v1530_v38  ;;  %v1693_v4 = vsel %vm1665_vm3, %v3142_v10, %v1528_v39  ;;  %v2182_v10 = vsel %vm1051_vm4, 1.0, %v2539_v26  ;;  %v1692_v39 = vsel %vm1665_vm3, %v3186_v35, %v1526_v59  ;;  %v4408_v38 = vld [vmem:[#allocation45_spill] sm:$0xff] }
 0x1a6   : > { %v3670_v55 = vpop.permute.xlu1 %1557  ;;  %v1758_v56 = vsel %vm316_vm1, %v1694_v28, %v2184_v27  ;;  %v1757_v36 = vsel %vm316_vm1, %v1693_v4, %v2183_v54  ;;  %vm4404_vm4 = vcmp.lt.s32.totalorder %v3034_v22, 600  ;;  %v1691_v35 = vsel %vm1665_vm3, %v3087_v20, %v1524_v24  ;;  %v4411_v24 = vld [vmem:[#allocation27_spill] sm:$0xff]  ;;  %v4418_v28 = vld [vmem:[#allocation37_spill] sm:$0xff]  ;;  %v4423_v54 = vld [vmem:[#allocation22_spill] sm:$0xff] }
 0x1a7   : > { %v2181_v62 = vsel %vm4404_vm4, 1.0, %v2539_v26  ;;  %v1756_v22 = vsel %vm316_vm1, %v1692_v39, %v2182_v10  ;;  %vm4419_vm12 = vcmp.lt.s32.totalorder %v4418_v28, 600  ;;  %v1672_v4 = vsel %vm1665_vm3, %v4423_v54, %v3603_v0  ;;  %v4447_v28 = vld [vmem:[#allocation14_spill] sm:$0xff] }
 0x1a8   : > { %v1536_v52 = vpop.permute.xlu0 %1535  ;;  %v1755_v50 = vsel %vm316_vm1, %v1691_v35, %v2181_v62 }
 0x1a9   : > { %v1697_v57 = vsel %vm1665_vm3, %v3269_v33, %v1536_v52  ;;  %v1679_v33 = vsel %vm1665_vm3, %v2993_v9, %v1500_v41  ;;  %v1678_v9 = vsel %vm1665_vm3, %v3014_v12, %v1498_v5  ;;  %v1677_v12 = vsel %vm1665_vm3, %v2939_v61, %v1496_v58 }
 0x1aa   : > { %v1761_v15 = vsel %vm316_vm1, %v1697_v57, %v2187_v14  ;;  %v1760_v14 = vsel %vm316_vm1, %v1696_v46, %v2186_v63  ;;  %v1759_v63 = vsel %vm316_vm1, %v1695_v42, %v2185_v45  ;;  %v3711_v43 = vpop.permute.xlu1 %1547  ;;  %v1743_v46 = vsel %vm316_vm1, %v1679_v33, %v2169_v13 }
 0x1ab   : > { %2300 = vmatprep.subr.mxu1 %v1761_v15  ;;  %v1742_v52 = vsel %vm316_vm1, %v1678_v9, %v2168_v1  ;;  %v1676_v61 = vsel %vm1665_vm3, %v2961_v30, %v3633_v6  ;;  %v1741_v59 = vsel %vm316_vm1, %v1677_v12, %v2167_v31  ;;  %v1675_v30 = vsel %vm1665_vm3, %v2882_v16, %v3614_v51  ;;  %v4406_v6 = vld [vmem:[#allocation41_spill] sm:$0xff]  ;;  %v4409_v16 = vld [vmem:[#allocation23_spill] sm:$0xff]  ;;  %v4414_v15 = vld [vmem:[#allocation38_spill] sm:$0xff] }
 0x1ac   : > { %2301 = vmatpush3.msra.mxu1 %v1745_v49  ;;  %v3691_v17 = vpop.permute.xlu0 %1599  ;;  %vm4407_vm7 = vcmp.lt.s32.totalorder %v4406_v6, 600  ;;  %v1690_v41 = vsel %vm1665_vm3, %v4408_v38, %v3647_v34  ;;  %v1740_v53 = vsel %vm316_vm1, %v1676_v61, %v2166_v19  ;;  %vm4410_vm8 = vcmp.lt.s32.totalorder %v4409_v16, 600  ;;  %v4415_v49 = vld [vmem:[#allocation17_spill] sm:$0xff]  ;;  %v4424_v31 = vld [vmem:[#allocation31_spill] sm:$0xff]  ;;  %v4429_v19 = vld [vmem:[#allocation16_spill] sm:$0xff] }
 0x1ad   : > { %2302 = vmatprep.subr.mxu1 %v1760_v14  ;;  %v2180_v20 = vsel %vm4407_vm7, 1.0, %v2539_v26  ;;  %v2164_v51 = vsel %vm4410_vm8, 1.0, %v2539_v26  ;;  %v1674_v57 = vsel %vm1665_vm3, %v4411_v24, %v3626_v60  ;;  %v2179_v34 = vsel %vm4413_vm10, 1.0, %v2539_v26  ;;  %v4417_v60 = vld [vmem:[#allocation20_spill] sm:$0xff]  ;;  %v4435_v6 = vld [vmem:[#allocation18_spill] sm:$0xff] }
 0x1ae   : > { %2303 = vmatpush3.msra.mxu1 %v1744_v48  ;;  %v3756_v5 = vpop.permute.xlu1 %1545  ;;  %v1689_v45 = vsel %vm1665_vm3, %v4414_v15, %v3641_v11  ;;  %v1739_v42 = vsel %vm316_vm1, %v1675_v30, %v2165_v37  ;;  %vm4416_vm11 = vcmp.lt.s32.totalorder %v4415_v49, 600  ;;  %v1673_v33 = vsel %vm1665_vm3, %v4417_v60, %v3589_v21  ;;  %v4420_v48 = vld [vmem:[#allocation40_spill] sm:$0xff] }
 0x1af   : > { %2304 = vmatprep.subr.mxu1 %v1759_v63  ;;  %v2163_v13 = vsel %vm4416_vm11, 1.0, %v2539_v26  ;;  %v1754_v27 = vsel %vm316_vm1, %v1690_v41, %v2180_v20  ;;  %v2178_v11 = vsel %vm4419_vm12, 1.0, %v2539_v26  ;;  %v1688_v1 = vsel %vm1665_vm3, %v4420_v48, %v3643_v47  ;;  %v4421_v63 = vld [vmem:[#allocation19_spill] sm:$0xff]  ;;  %v4426_v47 = vld [vmem:[#allocation34_spill] sm:$0xff]  ;;  %v4436_v41 = vld [vmem:[#allocation25_spill] sm:$0xff] }
 0x1b0   : > { %v3719_v40 = vpop.permute.xlu0 %1597  ;;  %2305 = vmatpush3.msra.mxu1 %v1743_v46  ;;  %v1738_v9 = vsel %vm316_vm1, %v1674_v57, %v2164_v51  ;;  %vm4422_vm13 = vcmp.lt.s32.totalorder %v4421_v63, 600  ;;  %v1753_v46 = vsel %vm316_vm1, %v1689_v45, %v2179_v34  ;;  %vm4425_vm15 = vcmp.lt.s32.totalorder %v4424_v31, 600  ;;  %v4439_v24 = vld [vmem:[#allocation8_spill] sm:$0xff]  ;;  %v4451_v63 = vld [vmem:[#allocation26_spill] sm:$0xff]  ;;  %v4454_v31 = vld [vmem:[#allocation89_spill] sm:$0xff] }
 0x1b1   : > { %2306 = vmatprep.subr.mxu1 %v1758_v56  ;;  %v2162_v21 = vsel %vm4422_vm13, 1.0, %v2539_v26  ;;  %v2177_v12 = vsel %vm4425_vm15, 1.0, %v2539_v26  ;;  %v1687_v56 = vsel %vm1665_vm3, %v4426_v47, %v3637_v18  ;;  %v1737_v39 = vsel %vm316_vm1, %v1673_v33, %v2163_v13  ;;  %v4430_v18 = vld [vmem:[#allocation33_spill] sm:$0xff]  ;;  %v4445_v33 = vld [vmem:[#allocation11_spill] sm:$0xff] }
 0x1b2   : > { %2307 = vmatpush3.msra.mxu1 %v1742_v52  ;;  %v3802_v10 = vpop.permute.xlu1 %1551  ;;  %v4427_v52 = vld [vmem:[#allocation13_spill] sm:$0xff]  ;;  %v1671_v61 = vsel %vm1665_vm3, %v4429_v19, %v3559_v44  ;;  %v1752_v62 = vsel %vm316_vm1, %v1688_v1, %v2178_v11  ;;  %vm4431_vm5 = vcmp.lt.s32.totalorder %v4430_v18, 600  ;;  %v1736_v30 = vsel %vm316_vm1, %v1672_v4, %v2162_v21  ;;  %v4452_v4 = vld [vmem:[#allocation6_spill] sm:$0xff] }
 0x1b3   : > { %2308 = vmatprep.subr.mxu1 %v1757_v36  ;;  %vm4428_vm0 = vcmp.lt.s32.totalorder %v4427_v52, 600  ;;  %v2176_v35 = vsel %vm4431_vm5, 1.0, %v2539_v26  ;;  %v1670_v20 = vsel %vm1665_vm3, %v4435_v6, %v3574_v29  ;;  %v1751_v38 = vsel %vm316_vm1, %v1687_v56, %v2177_v12  ;;  %v4441_v29 = vld [vmem:[#allocation12_spill] sm:$0xff] }
 0x1b4   : > { %v3747_v58 = vpop.permute.xlu0 %1595  ;;  %2309 = vmatpush3.msra.mxu1 %v1741_v59  ;;  %v2161_v0 = vsel %vm4428_vm0, 1.0, %v2539_v26  ;;  %v4432_v59 = vld [vmem:[#allocation36_spill] sm:$0xff]  ;;  %vm4437_vm6 = vcmp.lt.s32.totalorder %v4436_v41, 600  ;;  %vm4440_vm7 = vcmp.lt.s32.totalorder %v4439_v24, 600  ;;  %v1797_v15 = vsub.s32 0, %v2724_v3  ;;  %v4468_v24 = vld [vmem:[#allocation39_spill] sm:$0xff] }
 0x1b5   : > { %2310 = vmatprep.subr.mxu1 %v1756_v22  ;;  %v1686_v37 = vsel %vm1665_vm3, %v4432_v59, %v3639_v25  ;;  %v4433_v22 = vld [vmem:[#allocation15_spill] sm:$0xff]  ;;  %v4438_v25 = vld [vmem:[#allocation30_spill] sm:$0xff]  ;;  %v1735_v51 = vsel %vm316_vm1, %v1671_v61, %v2161_v0  ;;  %v2159_v57 = vsel %vm4440_vm7, 1.0, %v2539_v26  ;;  %v1809_v60 = vsub.s32 3, %v2724_v3  ;;  %v4457_v0 = vld [vmem:[#allocation24_spill] sm:$0xff] }
 0x1b6   : > { %2311 = vmatpush3.msra.mxu1 %v1740_v53  ;;  %vm4434_vm4 = vcmp.lt.s32.totalorder %v4433_v22, 600  ;;  %v2175_v53 = vsel %vm4437_vm6, 1.0, %v2539_v26  ;;  %v1685_v16 = vsel %vm1665_vm3, %v4438_v25, %v3631_v7  ;;  %v1750_v34 = vsel %vm316_vm1, %v1686_v37, %v2176_v35  ;;  %v4442_v7 = vld [vmem:[#allocation29_spill] sm:$0xff]  ;;  %v3851_v13 = vpop.permute.xlu1 %1549  ;;  %v4459_v61 = vld [vmem:[#allocation110_spill] sm:$0xff]  ;;  %v4461_v37 = vld [vmem:[#allocation7_spill] sm:$0xff] }
 0x1b7   : > { %2312 = vmatprep.subr.mxu1 %v1755_v50  ;;  %v2160_v44 = vsel %vm4434_vm4, 1.0, %v2539_v26  ;;  %v1669_v50 = vsel %vm1665_vm3, %v4441_v29, %v3525_v32  ;;  %vm4443_vm8 = vcmp.lt.s32.totalorder %v4442_v7, 600  ;;  %vm4446_vm10 = vcmp.lt.s32.totalorder %v4445_v33, 600  ;;  %v4463_v22 = vld [vmem:[#allocation93_spill] sm:$0xff]  ;;  %v4470_v29 = vld [vmem:[#allocation111_spill] sm:$0xff] }
 0x1b8   : > { %v3779_v14 = vpop.permute.xlu0 %1593  ;;  %2313 = vmatpush3.msra.mxu1 %v1739_v42  ;;  %v2174_v45 = vsel %vm4443_vm8, 1.0, %v2539_v26  ;;  %v4444_v42 = vld [vmem:[#allocation32_spill] sm:$0xff]  ;;  %v1734_v32 = vsel %vm316_vm1, %v1670_v20, %v2160_v44  ;;  %v1668_v11 = vsel %vm1665_vm3, %v4447_v28, %v3543_v23  ;;  %v1749_v48 = vsel %vm316_vm1, %v1685_v16, %v2175_v53  ;;  %v4455_v23 = vld [vmem:[#allocation9_spill] sm:$0xff]  ;;  %v4464_v44 = vld [vmem:[#allocation10_spill] sm:$0xff] }
 0x1b9   : > { %2314 = vmatprep.subr.mxu1 %v1754_v27  ;;  %v1684_v49 = vsel %vm1665_vm3, %v4444_v42, %v3635_v2  ;;  %v2158_v27 = vsel %vm4446_vm10, 1.0, %v2539_v26  ;;  %v4448_v2 = vld [vmem:[#allocation21_spill] sm:$0xff]  ;;  %v1733_v54 = vsel %vm316_vm1, %v1669_v50, %v2159_v57  ;;  %vm4453_vm12 = vcmp.lt.s32.totalorder %v4452_v4, 600  ;;  %v4467_v53 = vld [vmem:[#allocation60_spill] sm:$0xff]  ;;  %v4471_v50 = vld [vmem:[#allocation43_spill] sm:$0xff] }
 0x1ba   : > { %2315 = vmatpush3.msra.mxu1 %v1738_v9  ;;  %vm4449_vm11 = vcmp.lt.s32.totalorder %v4448_v2, 600  ;;  %v4450_v9 = vld [vmem:[#allocation108_spill] sm:$0xff]  ;;  %v1667_v12 = vsel %vm1665_vm3, %v4455_v23, %v4454_v31  ;;  %v1748_v56 = vsel %vm316_vm1, %v1684_v49, %v2174_v45  ;;  %vm4458_vm13 = vcmp.lt.s32.totalorder %v4457_v0, 600  ;;  %v1556_v16 = vpop.permute.xlu1 %1555  ;;  %v4474_v42 = vld [vmem:[#allocation65_spill] sm:$0xff]  ;;  %v4478_v28 = vld [vmem:[#allocation46_spill] sm:$0xff] }
 0x1bb   : > { %2316 = vmatprep.subr.mxu1 %v1753_v46  ;;  %v2173_v1 = vsel %vm4449_vm11, 1.0, %v2539_v26  ;;  %v1683_v21 = vsel %vm1665_vm3, %v4451_v63, %v4450_v9  ;;  %v2157_v46 = vsel %vm4453_vm12, 1.0, %v2539_v26  ;;  %v2172_v19 = vsel %vm4458_vm13, 1.0, %v2539_v26  ;;  %v4479_v2 = vld [vmem:[#allocation61_spill] sm:$0xff]  ;;  %v4486_v31 = vld [vmem:[#allocation48_spill] sm:$0xff] }
 0x1bc   : > { %v3811_v36 = vpop.permute.xlu0 %1591  ;;  %2317 = vmatpush3.msra.mxu1 %v1737_v39  ;;  %v4456_v39 = vld [vmem:[#allocation79_spill] sm:$0xff]  ;;  %v1732_v35 = vsel %vm316_vm1, %v1668_v11, %v2158_v27  ;;  %vm4462_vm15 = vcmp.lt.s32.totalorder %v4461_v37, 600  ;;  %v1666_v6 = vsel %vm1665_vm3, %v4464_v44, %v4463_v22  ;;  %v1747_v20 = vsel %vm316_vm1, %v1683_v21, %v2173_v1  ;;  %v4477_v27 = vld [vmem:[#allocation112_spill] sm:$0xff]  ;;  %v4481_v1 = vld [vmem:[#allocation69_spill] sm:$0xff] }
 0x1bd   : > { %2318 = vmatprep.subr.mxu1 %v1752_v62  ;;  %v1798_v52 = vrot.slane %v4456_v39, %v1797_v15  ;;  %v4460_v62 = vld [vmem:[#allocation28_spill] sm:$0xff]  ;;  %v1810_v59 = vrot.slane %v4456_v39, %v1809_v60  ;;  %v1729_v25 = vsel %vm1665_vm3, %v4467_v53, %v3691_v17  ;;  %vm4469_vm5 = vcmp.lt.s32.totalorder %v4468_v24, 600  ;;  %v4472_v17 = vld [vmem:[#allocation58_spill] sm:$0xff]  ;;  %v4493_v37 = vld [vmem:[#allocation51_spill] sm:$0xff] }
 0x1be   : > { %2319 = vmatpush3.msra.mxu1 %v1736_v30  ;;  %v1682_v18 = vsel %vm1665_vm3, %v4460_v62, %v4459_v61  ;;  %v2156_v30 = vsel %vm4462_vm15, 1.0, %v2539_v26  ;;  %v2203_v57 = vsel %vm4469_vm5, 1.0, %v2539_v26  ;;  %vm4473_vm6 = vcmp.lt.s32.totalorder %v4472_v17, 600  ;;  %v4475_v60 = vld [vmem:[#allocation42_spill] sm:$0xff]  ;;  %v4489_v0 = vld [vmem:[#allocation72_spill] sm:$0xff]  ;;  %v1554_v61 = vpop.permute.xlu1 %1553 }
 0x1bf   : > { %2320 = vmatprep.subr.mxu1 %v1751_v38  ;;  %v4465_v38 = vld [vmem:[#allocation54_spill] sm:$0xff]  ;;  %v1746_v7 = vsel %vm316_vm1, %v1682_v18, %v2172_v19  ;;  %vm1811_vm4 = vcmp.eq.s32.totalorder %v2724_v3, %v1798_v52  ;;  %v2218_v45 = vsel %vm4473_vm6, 1.0, %v2539_v26  ;;  %v1728_v49 = vsel %vm1665_vm3, %v4474_v42, %v3719_v40  ;;  %v4490_v18 = vld [vmem:[#allocation47_spill] sm:$0xff]  ;;  %v4494_v44 = vld [vmem:[#allocation68_spill] sm:$0xff] }
 0x1c0   : > { %v3841_v8 = vpop.permute.xlu0 %1589  ;;  %2321 = vmatpush3.msra.mxu1 %v1735_v51  ;;  %vm4466_vm0 = vcmp.lt.s32.totalorder %v4465_v38, 600  ;;  %v1731_v51 = vsel %vm316_vm1, %v1667_v12, %v2157_v46  ;;  %vm1814_vm7 = vcmp.eq.s32.totalorder %v2724_v3, %v1810_v59  ;;  %vm4476_vm8 = vcmp.lt.s32.totalorder %v4475_v60, 600  ;;  %v4485_v46 = vld [vmem:[#allocation113_spill] sm:$0xff]  ;;  %v4492_v59 = vld [vmem:[#allocation114_spill] sm:$0xff] }
 0x1c1   : > { %2322 = vmatprep.subr.mxu1 %v1750_v34  ;;  %v2219_v41 = vsel %vm4466_vm0, 1.0, %v2539_v26  ;;  %v1713_v34 = vsel %vm1665_vm3, %v4471_v50, %v4470_v29  ;;  %v2202_v33 = vsel %vm4476_vm8, 1.0, %v2539_v26  ;;  %v1712_v11 = vsel %vm1665_vm3, %v4478_v28, %v4477_v27  ;;  %v4531_v50 = vld [vmem:[#allocation99_spill] sm:$0xff] }
 0x1c2   : > { %2323 = vmatpush3.msra.mxu1 %v1734_v32  ;;  %v1730_v32 = vsel %vm316_vm1, %v1666_v6, %v2156_v30  ;;  %vm4480_vm10 = vcmp.lt.s32.totalorder %v4479_v2, 600  ;;  %v1727_v9 = vsel %vm1665_vm3, %v4481_v1, %v3747_v58  ;;  %v4482_v63 = vmov 1.0   ;;  %v4487_v58 = vld [vmem:[#allocation64_spill] sm:$0xff]  ;;  %v1544_v28 = vpop.permute.xlu1 %1543  ;;  %v4509_v2 = vld [vmem:[#allocation67_spill] sm:$0xff] }
 0x1c3   : > { %2324 = vmatprep.subr.mxu1 %v1749_v48  ;;  %v1793_v48 = vsel %vm316_vm1, %v1729_v25, %v2219_v41  ;;  %v2217_v40 = vsel %vm4480_vm10, 1.0, %v2539_v26  ;;  %v1777_v21 = vsel %vm316_vm1, %v1713_v34, %v2203_v57  ;;  %v1711_v23 = vsel %vm1665_vm3, %v4486_v31, %v4485_v46  ;;  %v4497_v41 = vld [vmem:[#allocation49_spill] sm:$0xff]  ;;  %v4499_v25 = vld [vmem:[#allocation115_spill] sm:$0xff]  ;;  %v4514_v46 = vld [vmem:[#allocation90_spill] sm:$0xff] }
 0x1c4   : > { %v3875_v47 = vpop.permute.xlu0 %1587  ;;  %2325 = vmatpush3.msra.mxu1 %v1733_v54  ;;  %v4483_v54 = vld [vmem:[#allocation44_spill] sm:$0xff]  ;;  %vm4488_vm12 = vcmp.lt.s32.totalorder %v4487_v58, 600  ;;  %v1726_v19 = vsel %vm1665_vm3, %v4489_v0, %v3779_v14  ;;  %v1776_v62 = vsel %vm316_vm1, %v1712_v11, %v2202_v33  ;;  %vm4491_vm13 = vcmp.lt.s32.totalorder %v4490_v18, 600  ;;  %v4506_v33 = vld [vmem:[#allocation78_spill] sm:$0xff]  ;;  %v4517_v58 = vld [vmem:[#allocation77_spill] sm:$0xff] }
 0x1c5   : > { %2326 = vmatprep.subr.mxu1 %v1748_v56  ;;  %vm4484_vm11 = vcmp.lt.s32.totalorder %v4483_v54, 600  ;;  %v1792_v56 = vsel %vm316_vm1, %v1728_v49, %v2218_v45  ;;  %v2216_v52 = vsel %vm4488_vm12, 1.0, %v2539_v26  ;;  %v1710_v30 = vsel %vm1665_vm3, %v4493_v37, %v4492_v59  ;;  %v4496_v14 = vld [vmem:[#allocation76_spill] sm:$0xff]  ;;  %v4503_v45 = vld [vmem:[#allocation50_spill] sm:$0xff]  ;;  %v4512_v54 = vld [vmem:[#allocation83_spill] sm:$0xff] }
 0x1c6   : > { %2327 = vmatpush3.msra.mxu1 %v1732_v35  ;;  %v2201_v4 = vsel %vm4484_vm11, 1.0, %v2539_v26  ;;  %v2200_v35 = vsel %vm4491_vm13, 1.0, %v2539_v26  ;;  %v1791_v22 = vsel %vm316_vm1, %v1727_v9, %v2217_v40  ;;  %vm4495_vm15 = vcmp.lt.s32.totalorder %v4494_v44, 600  ;;  %v4505_v49 = vld [vmem:[#allocation56_spill] sm:$0xff]  ;;  %v4518_v0 = vld [vmem:[#allocation86_spill] sm:$0xff] }
 0x1c7   : > { %2328 = vmatprep.subr.mxu1 %v1747_v20  ;;  %v2215_v6 = vsel %vm4495_vm15, 1.0, %v2539_v26  ;;  %v1725_v20 = vsel %vm1665_vm3, %v4496_v14, %v3811_v36  ;;  %v1775_v38 = vsel %vm316_vm1, %v1711_v23, %v2201_v4  ;;  %vm4498_vm0 = vcmp.lt.s32.totalorder %v4497_v41, 600  ;;  %v4502_v36 = vld [vmem:[#allocation81_spill] sm:$0xff]  ;;  %v4515_v23 = vld [vmem:[#allocation71_spill] sm:$0xff]  ;;  %v4523_v37 = vld [vmem:[#allocation66_spill] sm:$0xff] }
 0x1c8   : > { %v1586_v15 = vpop.permute.xlu0 %1585  ;;  %2329 = vmatpush3.msra.mxu1 %v1731_v51  ;;  %v2199_v53 = vsel %vm4498_vm0, 1.0, %v2539_v26  ;;  %v4500_v51 = vld [vmem:[#allocation53_spill] sm:$0xff]  ;;  %v1790_v29 = vsel %vm316_vm1, %v1726_v19, %v2216_v52  ;;  %v2214_v34 = vsel %vm1083_vm2, 1.0, %v2539_v26  ;;  %v1774_v17 = vsel %vm316_vm1, %v1710_v30, %v2200_v35  ;;  %v4521_v35 = vld [vmem:[#allocation59_spill] sm:$0xff]  ;;  %v4556_v44 = vld [vmem:[#allocation92_spill] sm:$0xff] }
 0x1c9   : > { %2330 = vmatprep.subr.mxu1 %v1746_v7  ;;  %v1709_v24 = vsel %vm1665_vm3, %v4500_v51, %v4499_v25  ;;  %v1724_v7 = vsel %vm1665_vm3, %v4502_v36, %v3841_v8  ;;  %vm4504_vm5 = vcmp.lt.s32.totalorder %v4503_v45, 600  ;;  %v1789_v60 = vsel %vm316_vm1, %v1725_v20, %v2215_v6  ;;  %v4508_v8 = vld [vmem:[#allocation85_spill] sm:$0xff]  ;;  %v4526_v41 = vld [vmem:[#allocation63_spill] sm:$0xff]  ;;  %v4532_v36 = vld [vmem:[#allocation52_spill] sm:$0xff] }
 0x1ca   : > { %2331 = vmatpush3.msra.mxu1 %v1730_v32  ;;  %v2198_v42 = vsel %vm4504_vm5, 1.0, %v2539_v26  ;;  %v1708_v32 = vsel %vm1665_vm3, %v4505_v49, %v3670_v55  ;;  %vm4507_vm2 = vcmp.lt.s32.totalorder %v4506_v33, 600  ;;  %v1723_v11 = vsel %vm1665_vm3, %v4508_v8, %v3875_v47  ;;  %v4511_v55 = vld [vmem:[#allocation73_spill] sm:$0xff]  ;;  %v4535_v49 = vld [vmem:[#allocation98_spill] sm:$0xff]  ;;  %v4538_v8 = vld [vmem:[#allocation55_spill] sm:$0xff] }
 0x1cb   : > { %2335 = vmatprep.subr.mxu1 %v1793_v48  ;;  %2225 = vmatmul.mubr.msk.f32.vlgmr.msra.gmra.mxu1 %vm1811_vm4, %v4482_v63  ;;  %v2213_v27 = vsel %vm4507_vm2, 1.0, %v2539_v26  ;;  %v1773_v48 = vsel %vm316_vm1, %v1709_v24, %v2199_v53  ;;  %vm4510_vm4 = vcmp.lt.s32.totalorder %v4509_v2, 600  ;;  %v1707_v1 = vsel %vm1665_vm3, %v4511_v55, %v1556_v16  ;;  %v4525_v14 = vld [vmem:[#allocation97_spill] sm:$0xff]  ;;  %v4529_v24 = vld [vmem:[#allocation95_spill] sm:$0xff] }
 0x1cc   : > { %v1584_v12 = vpop.permute.xlu0 %1583  ;;  %2336 = vmatpush3.msra.mxu1 %v1777_v21  ;;  %2226 = vmatprep.mubr.msk.f32.mxu1 %vm1814_vm7, %v4482_v63  ;;  %v2197_v40 = vsel %vm4510_vm4, 1.0, %v2539_v26  ;;  %v1788_v21 = vsel %vm316_vm1, %v1724_v7, %v2214_v34  ;;  %vm4513_vm6 = vcmp.lt.s32.totalorder %v4512_v54, 600  ;;  %v1722_v47 = vsel %vm1665_vm3, %v4514_v46, %v1586_v15 }
 0x1cd   : > { %2337 = vmatprep.subr.mxu1 %v1792_v56  ;;  %v2212_v4 = vsel %vm4513_vm6, 1.0, %v2539_v26  ;;  %v1772_v31 = vsel %vm316_vm1, %v1708_v32, %v2198_v42  ;;  %vm4516_vm7 = vcmp.lt.s32.totalorder %v4515_v23, 600  ;;  %v1706_v16 = vsel %vm1665_vm3, %v4517_v58, %v1554_v61 }
 0x1ce   : > { %2338 = vmatpush3.msra.mxu1 %v1776_v62  ;;  %v2196_v56 = vsel %vm4516_vm7, 1.0, %v2539_v26  ;;  %v1787_v52 = vsel %vm316_vm1, %v1723_v11, %v2213_v27  ;;  %vm4519_vm8 = vcmp.lt.s32.totalorder %v4518_v0, 600  ;;  %v4520_v62 = vld [vmem:[#allocation94_spill] sm:$0xff]  ;;  %v1771_v18 = vsel %vm316_vm1, %v1707_v1, %v2197_v40  ;;  %v4541_v40 = vld [vmem:[#allocation100_spill] sm:$0xff] }
 0x1cf   : > { %2339 = vmatprep.subr.mxu1 %v1791_v22  ;;  %v2211_v19 = vsel %vm4519_vm8, 1.0, %v2539_v26  ;;  %v1721_v15 = vsel %vm1665_vm3, %v4520_v62, %v1584_v12  ;;  %vm4522_vm10 = vcmp.lt.s32.totalorder %v4521_v35, 600  ;;  %v1705_v61 = vsel %vm1665_vm3, %v4523_v37, %v3802_v10  ;;  %v1542_v12 = vpop.permute.xlu1 %1541  ;;  %v4528_v10 = vld [vmem:[#allocation70_spill] sm:$0xff] }
 0x1d0   : > { %v1582_v57 = vpop.permute.xlu0 %1581  ;;  %2340 = vmatpush3.msra.mxu1 %v1775_v38  ;;  %v2195_v59 = vsel %vm4522_vm10, 1.0, %v2539_v26  ;;  %v1786_v22 = vsel %vm316_vm1, %v1722_v47, %v2212_v4  ;;  %v2210_v6 = vsel %vm1079_vm9, 1.0, %v2539_v26  ;;  %v1770_v38 = vsel %vm316_vm1, %v1706_v16, %v2196_v56  ;;  %v4544_v4 = vld [vmem:[#allocation75_spill] sm:$0xff]  ;;  %v4546_v47 = vld [vmem:[#allocation82_spill] sm:$0xff]  ;;  %v4549_v16 = vld [vmem:[#allocation105_spill] sm:$0xff] }
 0x1d1   : > { %2341 = vmatprep.subr.mxu1 %v1790_v29  ;;  %v1720_v20 = vsel %vm1665_vm3, %v4525_v14, %v1582_v57  ;;  %vm4527_vm11 = vcmp.lt.s32.totalorder %v4526_v41, 600  ;;  %v1704_v25 = vsel %vm1665_vm3, %v4528_v10, %v3851_v13  ;;  %v1785_v51 = vsel %vm316_vm1, %v1721_v15, %v2211_v19  ;;  %v4547_v56 = vld [vmem:[#allocation102_spill] sm:$0xff]  ;;  %v4550_v19 = vld [vmem:[#allocation80_spill] sm:$0xff]  ;;  %v4552_v15 = vld [vmem:[#allocation87_spill] sm:$0xff] }
 0x1d2   : > { %2342 = vmatpush3.msra.mxu1 %v1774_v17  ;;  %v2194_v53 = vsel %vm4527_vm11, 1.0, %v2539_v26  ;;  %vm4530_vm9 = vcmp.lt.s32.totalorder %v4529_v24, 600  ;;  %v1769_v34 = vsel %vm316_vm1, %v1705_v61, %v2195_v59  ;;  %vm4533_vm12 = vcmp.lt.s32.totalorder %v4532_v36, 600  ;;  %v4534_v17 = vld [vmem:[#allocation57_spill] sm:$0xff] }
 0x1d3   : > { %2343 = vmatprep.subr.mxu1 %v1789_v60  ;;  %v2209_v29 = vsel %vm4530_vm9, 1.0, %v2539_v26  ;;  %v2193_v7 = vsel %vm4533_vm12, 1.0, %v2539_v26  ;;  %v1703_v13 = vsel %vm1665_vm3, %v4534_v17, %v3711_v43  ;;  %v1784_v42 = vsel %vm316_vm1, %v1720_v20, %v2210_v6  ;;  %v4537_v60 = vld [vmem:[#allocation101_spill] sm:$0xff]  ;;  %v4540_v43 = vld [vmem:[#allocation62_spill] sm:$0xff]  ;;  %v1540_v1 = vpop.permute.xlu1 %1539 }
 0x1d4   : > { %v1580_v9 = vpop.permute.xlu0 %1579  ;;  %2344 = vmatpush3.msra.mxu1 %v1773_v48  ;;  %vm4536_vm13 = vcmp.lt.s32.totalorder %v4535_v49, 600  ;;  %v1768_v27 = vsel %vm316_vm1, %v1704_v25, %v2194_v53  ;;  %vm4539_vm15 = vcmp.lt.s32.totalorder %v4538_v8, 600  ;;  %v1702_v48 = vsel %vm1665_vm3, %v4540_v43, %v3756_v5  ;;  %v4563_v17 = vld [vmem:[#allocation109_spill] sm:$0xff] }
 0x1d5   : > { %2345 = vmatprep.subr.mxu1 %v1788_v21  ;;  %v1719_v57 = vsel %vm1665_vm3, %v4531_v50, %v1580_v9  ;;  %v2208_v32 = vsel %vm4536_vm13, 1.0, %v2539_v26  ;;  %v2192_v11 = vsel %vm4539_vm15, 1.0, %v2539_v26  ;;  %vm4542_vm0 = vcmp.lt.s32.totalorder %v4541_v40, 600  ;;  %v4543_v9 = vld [vmem:[#allocation103_spill] sm:$0xff]  ;;  %v4560_v50 = vld [vmem:[#allocation88_spill] sm:$0xff] }
 0x1d6   : > { %2346 = vmatpush3.msra.mxu1 %v1772_v31  ;;  %v1783_v2 = vsel %vm316_vm1, %v1719_v57, %v2209_v29  ;;  %v2207_v55 = vsel %vm4542_vm0, 1.0, %v2539_v26  ;;  %v1767_v54 = vsel %vm316_vm1, %v1703_v13, %v2193_v7  ;;  %vm4545_vm5 = vcmp.lt.s32.totalorder %v4544_v4, 600 }
 0x1d7   : > { %2347 = vmatprep.subr.mxu1 %v1787_v52  ;;  %v2191_v46 = vsel %vm4545_vm5, 1.0, %v2539_v26  ;;  %v1701_v5 = vsel %vm1665_vm3, %v4546_v47, %v1544_v28  ;;  %vm4548_vm2 = vcmp.lt.s32.totalorder %v4547_v56, 600  ;;  %v1766_v0 = vsel %vm316_vm1, %v1702_v48, %v2192_v11  ;;  %v1538_v20 = vpop.permute.xlu1 %1537 }
 0x1d8   : > { %v1578_v30 = vpop.permute.xlu0 %1577  ;;  %2348 = vmatpush3.msra.mxu1 %v1771_v18  ;;  %v2206_v58 = vsel %vm4548_vm2, 1.0, %v2539_v26  ;;  %vm4551_vm4 = vcmp.lt.s32.totalorder %v4550_v19, 600  ;;  %v1700_v28 = vsel %vm1665_vm3, %v4552_v15, %v1542_v12  ;;  %v1805_v35 = vsub.s32 2, %v2724_v3 }
 0x1d9   : > { %2349 = vmatprep.subr.mxu1 %v1786_v22  ;;  %v1718_v33 = vsel %vm1665_vm3, %v4537_v60, %v1578_v30  ;;  %v2190_v62 = vsel %vm4551_vm4, 1.0, %v2539_v26  ;;  %v2205_v37 = vsel %vm1074_vm14, 1.0, %v2539_v26  ;;  %v1765_v61 = vsel %vm316_vm1, %v1701_v5, %v2191_v46  ;;  %v4554_v30 = vld [vmem:[#allocation84_spill] sm:$0xff] }
 0x1da   : > { %2350 = vmatpush3.msra.mxu1 %v1770_v38  ;;  %v1782_v23 = vsel %vm316_vm1, %v1718_v33, %v2208_v32  ;;  %vm4555_vm6 = vcmp.lt.s32.totalorder %v4554_v30, 600  ;;  %v1699_v6 = vsel %vm1665_vm3, %v4556_v44, %v1540_v1  ;;  %v4557_v38 = vld [vmem:[#allocation107_spill] sm:$0xff]  ;;  %v1764_v53 = vsel %vm316_vm1, %v1700_v28, %v2190_v62 }
 0x1db   : > { %2351 = vmatprep.subr.mxu1 %v1785_v51  ;;  %v2189_v22 = vsel %vm4555_vm6, 1.0, %v2539_v26  ;;  %v1806_v25 = vrot.slane %v4456_v39, %v1805_v35  ;;  %v4558_v51 = vld [vmem:[#allocation106_spill] sm:$0xff]  ;;  %vm4561_vm7 = vcmp.lt.s32.totalorder %v4560_v50, 600  ;;  %vm1965_vm10 = vcmask 67584  }
 0x1dc   : > { %v1576_v45 = vpop.permute.xlu0 %1575  ;;  %2352 = vmatpush3.msra.mxu1 %v1769_v34  ;;  %vm4559_vm14 = vcmp.lt.s32.totalorder %v4558_v51, 600  ;;  %v1763_v29 = vsel %vm316_vm1, %v1699_v6, %v2189_v22  ;;  %v2188_v57 = vsel %vm4561_vm7, 1.0, %v2539_v26  ;;  %v4562_v34 = vld [vmem:[#allocation96_spill] sm:$0xff] }
 0x1dd   : > { %2353 = vmatprep.subr.mxu1 %v1784_v42  ;;  %v1717_v21 = vsel %vm1665_vm3, %v4543_v9, %v1576_v45  ;;  %v2204_v24 = vsel %vm4559_vm14, 1.0, %v2539_v26  ;;  %v1698_v36 = vsel %vm1665_vm3, %v4562_v34, %v1538_v20  ;;  %vm1813_vm8 = vcmp.eq.s32.totalorder %v2724_v3, %v1806_v25 }
 0x1de   : > { %2354 = vmatpush3.msra.mxu1 %v1768_v27  ;;  %v1781_v18 = vsel %vm316_vm1, %v1717_v21, %v2207_v55  ;;  %v1762_v45 = vsel %vm316_vm1, %v1698_v36, %v2188_v57  ;;  %v1823_v27 = vld [vmem:[#allocation2] sm:$0x7] }
 0x1df   : > { %2355 = vmatprep.subr.mxu1 %v1783_v2 }
 0x1e0   : > { %v1574_v31 = vpop.permute.xlu0 %1573  ;;  %2356 = vmatpush3.msra.mxu1 %v1767_v54 }
 0x1e1   : > { %v1716_v52 = vsel %vm1665_vm3, %v4549_v16, %v1574_v31  ;;  %2357 = vmatprep.subr.mxu1 %v1782_v23 }
 0x1e2   : > { %2358 = vmatpush3.msra.mxu1 %v1766_v0  ;;  %v1780_v14 = vsel %vm316_vm1, %v1716_v52, %v2206_v58 }
 0x1e3   : > { %2359 = vmatprep.subr.mxu1 %v1781_v18 }
 0x1e4   : > { %v1572_v12 = vpop.permute.xlu0 %1571  ;;  %2360 = vmatpush3.msra.mxu1 %v1765_v61 }
 0x1e5   : > { %v1715_v41 = vsel %vm1665_vm3, %v4557_v38, %v1572_v12  ;;  %2361 = vmatprep.subr.mxu1 %v1780_v14 }
 0x1e6   : > { %2362 = vmatpush3.msra.mxu1 %v1764_v53  ;;  %v1779_v10 = vsel %vm316_vm1, %v1715_v41, %v2205_v37 }
 0x1e7   : > { %2363 = vmatprep.subr.mxu1 %v1779_v10 }
 0x1e8   : > { %v1570_v7 = vpop.permute.xlu0 %1569  ;;  %2364 = vmatpush3.msra.mxu1 %v1763_v29 }
 0x1e9   : > { %v1714_v13 = vsel %vm1665_vm3, %v4563_v17, %v1570_v7 }
 0x1ea   : > { %v1778_v39 = vsel %vm316_vm1, %v1714_v13, %v2204_v24 }
 0x1eb   : > { %2365 = vmatprep.subr.mxu1 %v1778_v39 }
 0x1ec   : > { %2366 = vmatpush3.msra.mxu1 %v1762_v45 }
 0x1ed   : > { %2227 = vmatmul.mubr.msk.f32.vlgmr.msra.gmra.mxu1 %vm1813_vm8, %v4482_v63 }
 0x28b   : > { %v2332_v42 = vpop.f32.mrf.mxu1 }
 0x28d   : > { %v2333_v26 = vpop.f32.mrf.mxu1 }
 0x28e   : > { %v2334_v60 = vadd.f32 %v2333_v26, %v2332_v42 }
 0x2ad   : > { %v2367_v49 = vpop.f32.mrf.mxu1 }
 0x2af   : > { %v2368_v32 = vpop.f32.mrf.mxu1 }
 0x2b0   : > { %v2369_v33 = vadd.f32 %v2368_v32, %v2367_v49 }
 0x2b2   : > { %v1961_v8 = vadd.f32 %v2369_v33, %v2334_v60  ;;  %1970 = sbr.rel (%p2228_p6) target bundleno = 989 (0x3dd), region = 44 }
 0x2b4   : > { %v1964_v11 = vadd.f32 %v1961_v8, %v1823_v27 }
 0x2b6   : > { %1966 = vst.msk [vmem:[#allocation2] sm:$0x7] %vm1965_vm10, %v1964_v11 }
 0x2b7   : > { %v2540_v43 = vmov 8   ;;  %v2541_v55 = vmov 0   ;;  %v2230_v52 = vld [vmem:[%s4136_s2] ss:$0 sm:$0xff]  ;;  %vm2026_vm12 = vcmask 59392  }
 0x2b8   : > { %2492 = vset.pattern.permute.xlu0 %v2540_v43  ;;  %2493 = vset.pattern.permute.xlu1 %v2540_v43 }
 0x2bd   : > { %v1971_v3 = vld [vmem:[#allocation2] sm:$0x7] }
 0x2be   : > { %v1972_v48 = vmax.f32 %v1971_v3, 1.0  ;;  %v2229_v63 = vadd.f32 -1.0, %v1971_v3  ;;  %vm2010_vm1 = vcmp.gt.f32.partialorder %v1971_v3, 0.0 }
 0x2bf   : > { %v2019_v1 = vsel %vm2010_vm1, 1, %v2541_v55 }
 0x2c0   : > { %1975 = vperm.xlu0 %2492, %v1972_v48   ;;  %v1994_v2 = vmax.f32 %v2229_v63, 1.0 }
 0x2c2   : > { %v1995_v40 = vadd.f32 1e-06, %v1994_v2 }
 0x2c4   : > { %1982 = vperm.xlu0 %2492, %v1971_v3   ;;  %1998 = vperm.xlu1 %2493, %v1995_v40  }
 0x2c8   : > { %2021 = vperm.xlu0 %2492, %v2019_v1  }
 0x33b   : > { %v1976_v9 = vpop.permute.xlu0 %1975 }
 0x33c   : > { %2494 = vrcp.f32 %v1976_v9 }
 0x33f   : > { %v1983_v4 = vpop.permute.xlu0 %1982  ;;  %v1999_v5 = vpop.permute.xlu1 %1998 }
 0x340   : > { %2496 = vrcp.f32 %v1999_v5 }
 0x343   : > { %v2022_v62 = vpop.permute.xlu0 %2021 }
 0x344   : > { %vm2023_vm9 = vcmp.eq.s32.totalorder %v2022_v62, 1 }
 0x349   : > { %v2495_v21 = vpop.eup %2494 }
 0x34a   : > { %v1979_v54 = vmul.f32 %v2495_v21, %v1971_v3 }
 0x34c   : > { %v1985_v46 = vmul.f32 %v1983_v4, %v1979_v54  ;;  %v2018_v19 = vadd.f32 %v2230_v52, %v1979_v54 }
 0x34d   : > { %v2497_v56 = vpop.eup %2496 }
 0x34e   : > { %v1986_v47 = vmul.f32 %v1985_v46, %v1979_v54  ;;  %v2024_v35 = vsel %vm2023_vm9, %v2018_v19, 0.0 }
 0x350   : > { %1988 = vrot.lane.b32.xlu1 %v1986_v47, %s2542_s6 }
 0x3c2   : > { %v1989_v31 = vpop.permute.xlu1 %1988 }
 0x3c3   : > { %v1991_v23 = vsub.f32 %v1971_v3, %v1989_v31 }
 0x3c5   : > { %v1992_v58 = vmax.f32 %v1991_v23, 0.0 }
 0x3c7   : > { %v2002_v16 = vmul.f32 %v2497_v56, %v1992_v58 }
 0x3c9   : > { %2498 = vrsqrt.f32 %v2002_v16  ;;  %vm2005_vm11 = vcmp.eq.f32.partialorder %v2002_v16, inf  ;;  %v2008_v28 = vand.u32 2147483648, %v2002_v16  ;;  %vm2007_vm13 = vcmp.eq.f32.partialorder %v2002_v16, 0.0 }
 0x3d6   : > { %v2499_v0 = vpop.eup %2498 }
 0x3d7   : > { %v2004_v15 = vmul.f32 %v2499_v0, %v2002_v16 }
 0x3d9   : > { %v2006_v18 = vsel %vm2005_vm11, %v2002_v16, %v2004_v15 }
 0x3da   : > { %v2009_v59 = vsel %vm2007_vm13, %v2008_v28, %v2006_v18 }
 0x3db   : > { %v2025_v37 = vsel %vm1665_vm3, %v2024_v35, %v2009_v59 }
 0x3dc   : > { %2027 = vst.msk [vmem:[#allocation3] sm:$0x7] %vm2026_vm12, %v2025_v37 }
 0x3dd PF: > { %p2474_p7 = scmp.eq.s32.totalorder %s2575_s16, 1  ;;  %s2543_s9 = smov [#allocation3]  }
 0x3de   : > { %s2035_s10 = sshll.u32 %s2543_s9, 4  ;;  %s2036_s10 = int_to_ptr.vmem [resolvable:$true] %s2035_s10 }
 0x3df   : > { %s2500_s11 = scalar_lea.vmem %s2036_s10, 64  ;;  %p2507_p11 = scmp.lt.s32.totalorder %s2036_s10, %s2036_s10 }
 0x3e0   : > { %p2501_p8 = scmp.ne.s32.totalorder %s2036_s10, %s2500_s11  ;;  %p2508_p12 = scmp.lt.s32.totalorder %s2500_s11, %s2500_s11 }
 0x3e2   : > { %p2502_p9 = pnand %p2501_p8, %p2474_p7  ;;  %p2509_p13 = por %p2508_p12, %p2507_p11 }
 0x3e4   : > { %p2503_p10 = pneg %p2502_p9 }
 0x3e6   : > { %p2510_p0 = pnand %p2509_p13, %p2503_p10 }
 0x3e8   : > { %2513 = shalt.err (!%p2510_p0)
}
 0x3e9   : > { %2471 = dma.vmem_to_hbm [thread:$0]  (%p2474_p7), %s2036_s10, 64, %s4138_s4, [#allocation4]  }
 0x3ea   : > { %2529 = dma.done.wait (%p2474_p7), [#allocation4], 64  }
 0x3eb   : > { %2531 = vsyncadd (%p2474_p7), [#allocation4], 4294967232 }
 0x3ec PF: > { %s15_s15 = sadd.s32 1, %s2534_s15  }
 0x3ed   : > { %p12_p1 = scmp.ge.s32.totalorder %s15_s15, 4  }
 0x3ef   :  { %14 = sbr.rel (!%p12_p1) target bundleno = 1 (0x1), region = 74 }
 0x3f4   :  { %2048 = vsyncpa [#allocation4], 1 }
 0x3f5   :  { %2050 = vsyncpa [#allocation4 + $0x1], 1 }

</bundles_post_ra>
